<compile_context>
chip_gen: v6e
topology: v6e:2x2x1
jax: 0.10.0
libtpu: 0.0.40
codegen_flags: <defaults>
</compile_context>

<pallas_src>
import functools

import jax
import jax.numpy as jnp
from jax import lax
from jax.experimental import pallas as pl
from jax.experimental.pallas import tpu as pltpu


def _round_up(x, m):
    return ((x + m - 1) // m) * m


def _vmem_capacity_bytes(default=64 << 20):
    """Physical VMEM per TensorCore; conservative fallback if query fails."""
    try:
        info_fn = getattr(pltpu, "get_tpu_info", None)
        if info_fn is None:
            return default
        cap = getattr(info_fn(), "vmem_capacity_bytes", None)
        if not cap or int(cap) <= 0:
            return default
        return int(cap)
    except Exception:  # defensive: never let a HW query break the kernel
        return default


# ---------------------------------------------------------------------------
# Pallas kernel: one (batch item, TH output rows) tile of the fused conv.
#   x_ref : (1, Hp_tot, Wp, Cin)    whole padded NHWC image (resident per n)
#   w_ref : (kH*kW*Cin, Cout_p)     tap-folded weight matrix (resident)
#   b_ref : (1, Cout_p)             bias, f32 (resident)
#   o_ref : (1, TH, W_out, Cout_p)  output tile (NHWC, lane-dense Cout_p)
# ---------------------------------------------------------------------------
def _qconv_kernel(x_ref, w_ref, b_ref, o_ref, *,
                  kH, kW, stride, dilation, TH, W_out, Cin):
    h0 = pl.multiple_of(pl.program_id(1) * (TH * stride), TH * stride)
    parts = []
    if stride == 1:
        # Fast path: direct ref window loads; taps concatenated along the
        # contraction axis -> one big-K matmul per tile.
        for kh in range(kH):
            rows = pl.ds(h0 + kh * dilation, TH)
            for kw in range(kW):
                cols = pl.ds(kw * dilation, W_out)
                parts.append(x_ref[0, rows, cols, :])            # (TH, W_out, Cin)
    else:
        # TODO(synk): stride>1 uses strided value slices (slower); consider
        # phase-decomposing the input in the wrapper if this path gets hot.
        rows_needed = (TH - 1) * stride + (kH - 1) * dilation + 1
        slab = x_ref[0, pl.ds(h0, rows_needed), :, :]            # (rows, Wp, Cin)
        for kh in range(kH):
            for kw in range(kW):
                parts.append(lax.slice(
                    slab,
                    (kh * dilation, kw * dilation, 0),
                    (kh * dilation + (TH - 1) * stride + 1,
                     kw * dilation + (W_out - 1) * stride + 1,
                     Cin),
                    (stride, stride, 1)))                        # (TH, W_out, Cin)

    patch = jnp.concatenate(parts, axis=-1)                      # (TH, W_out, T*Cin)
    M = TH * W_out
    acc = jnp.dot(patch.reshape(M, kH * kW * Cin), w_ref[...],
                  preferred_element_type=jnp.float32)            # (M, Cout_p) f32
    out = acc + b_ref[...]                                       # bias once, in f32
    o_ref[...] = out.reshape(1, TH, W_out, -1).astype(o_ref.dtype)


# ---------------------------------------------------------------------------
# Wrapper: Hamilton-product weight glue + geometry + pallas_call
# ---------------------------------------------------------------------------
def quaternion_conv2d(x, r_w, i_w, j_w, k_w, bias,
                      stride=1, padding=0, dilation=1,
                      compute_dtype=jnp.bfloat16, target_m=512):
    """Quaternion conv2d (groups=1), matching quaternion_conv() in qharmonic.py.

    x is NCHW (PyTorch convention); output is NCHW.
    compute_dtype feeds the MXU (bf16 by default); accumulation is always f32.
    """
    N, Cin, H, W = x.shape
    Cout_q, Cin_q, kH, kW = r_w.shape
    Cout = 4 * Cout_q
    assert Cin == 4 * Cin_q, "input channels must be 4 * quaternion in_channels"

    # ---- Hamilton-product weight construction (parameter glue, plain JAX) ----
    cat_r = jnp.concatenate([r_w, -i_w, -j_w, -k_w], axis=1)
    cat_i = jnp.concatenate([i_w,  r_w, -k_w,  j_w], axis=1)
    cat_j = jnp.concatenate([j_w,  k_w,  r_w, -i_w], axis=1)
    cat_k = jnp.concatenate([k_w, -j_w,  i_w,  r_w], axis=1)
    W_oihw = jnp.concatenate([cat_r, cat_i, cat_j, cat_k], axis=0)  # (Cout,Cin,kH,kW)

    T = kH * kW
    Kdim = T * Cin
    Cout_p = _round_up(Cout, 128)

    # Tap-folded weight: rows ordered (kh, kw, cin) to match the kernel's window
    # concatenation; zero-padded columns keep the output lane-dense.
    W2d = W_oihw.transpose(2, 3, 1, 0).reshape(Kdim, Cout)
    if Cout_p != Cout:
        W2d = jnp.pad(W2d, ((0, 0), (0, Cout_p - Cout)))
    W2d = W2d.astype(compute_dtype)

    if bias is None:
        bias = jnp.zeros((Cout,), jnp.float32)
    b2d = jnp.zeros((1, Cout_p), jnp.float32).at[0, :Cout].set(
        bias.astype(jnp.float32))

    # ---- output geometry ----
    Hp = H + 2 * padding
    Wp = W + 2 * padding
    H_out = (Hp - dilation * (kH - 1) - 1) // stride + 1
    W_out = (Wp - dilation * (kW - 1) - 1) // stride + 1

    # Output-row tile so that M = TH * W_out is a few hundred rows.
    TH = max(1, min(H_out, -(-target_m // W_out)))
    n_h = -(-H_out // TH)
    H_out_pad = n_h * TH

    # Extra bottom padding so every window read of the last row-tile is in-bounds.
    Hp_need = (H_out_pad - 1) * stride + (kH - 1) * dilation + 1
    extra = max(0, Hp_need - Hp)

    # NCHW -> NHWC + spatial zero-pad (single fused XLA pass; no HBM im2col).
    x_nhwc = jnp.transpose(x, (0, 2, 3, 1))
    x_pad = jnp.pad(x_nhwc, ((0, 0), (padding, padding + extra),
                             (padding, padding), (0, 0))).astype(compute_dtype)
    Hp_tot = Hp + extra

    # ---- VMEM budget (derived from actual chip capacity) ----
    cbytes = jnp.dtype(compute_dtype).itemsize
    obytes = jnp.dtype(x.dtype).itemsize
    x_blk = Hp_tot * Wp * Cin * cbytes
    w_blk = Kdim * Cout_p * cbytes
    b_blk = Cout_p * 4
    o_blk = TH * W_out * Cout_p * obytes
    patch_b = TH * W_out * Kdim * cbytes          # in-kernel folded patch value
    acc_b = TH * W_out * Cout_p * 4               # f32 matmul result value
    vmem_needed = 2 * (x_blk + w_blk + b_blk + o_blk) + patch_b + acc_b
    vmem_cap = _vmem_capacity_bytes()
    vmem_limit = int(max(16 << 20,
                         min(max(vmem_needed + (4 << 20), 32 << 20),
                             vmem_cap - (4 << 20))))
    # TODO(synk): if vmem_needed exceeds vmem_cap (huge images on v7x's
    # 64 MiB/TC), switch the x input to halo row-slab tiling (pl.ANY + manual
    # make_async_copy double buffering) instead of whole-image residency.

    kernel = functools.partial(
        _qconv_kernel, kH=kH, kW=kW, stride=stride, dilation=dilation,
        TH=TH, W_out=W_out, Cin=Cin)

    flops = 2 * N * H_out * W_out * Kdim * Cout
    bytes_accessed = (x_pad.size * cbytes + W2d.size * cbytes
                      + N * H_out_pad * W_out * Cout_p * obytes)

    out_nhwc = pl.pallas_call(
        kernel,
        out_shape=jax.ShapeDtypeStruct((N, H_out_pad, W_out, Cout_p), x.dtype),
        grid_spec=pltpu.PrefetchScalarGridSpec(
            num_scalar_prefetch=0,
            grid=(N, n_h),
            in_specs=[
                # whole padded image for batch n; block index constant across
                # the h axis -> fetched once per n, resident for all row tiles.
                pl.BlockSpec((1, Hp_tot, Wp, Cin), lambda n, h: (n, 0, 0, 0)),
                # tap-folded weights, resident
                pl.BlockSpec((Kdim, Cout_p), lambda n, h: (0, 0)),
                # bias, resident
                pl.BlockSpec((1, Cout_p), lambda n, h: (0, 0)),
            ],
            out_specs=pl.BlockSpec((1, TH, W_out, Cout_p),
                                   lambda n, h: (n, h, 0, 0)),
        ),
        compiler_params=pltpu.CompilerParams(
            dimension_semantics=("parallel", "parallel"),
            vmem_limit_bytes=vmem_limit),
        cost_estimate=pl.CostEstimate(
            flops=flops, transcendentals=0, bytes_accessed=bytes_accessed),
    )(x_pad, W2d, b2d)

    # Strip Cout/H padding; back to NCHW (XLA fuses the slice+transpose).
    # TODO(synk): for small Cout the Cout->128 lane padding still write-
    #             amplifies the HBM output; a Cout-on-sublane layout would fix it.
    out = out_nhwc[:, :H_out, :, :Cout]
    return jnp.transpose(out, (0, 3, 1, 2))


# ---------------------------------------------------------------------------
# Deterministic parameter init (synthetic; glorot-style scale like quaternion_init)
# ---------------------------------------------------------------------------
def init_params(key, in_channels, out_channels, kernel_size):
    cin_q, cout_q = in_channels // 4, out_channels // 4
    w_shape = (cout_q, cin_q, kernel_size, kernel_size)
    fan_in = cin_q * kernel_size * kernel_size
    fan_out = cout_q * kernel_size * kernel_size
    s = (2.0 / (fan_in + fan_out)) ** 0.5  # glorot criterion used by quaternion_init
    kr, ki, kj, kk = jax.random.split(key, 4)
    r_w = s * jax.random.normal(kr, w_shape, dtype=jnp.float32)
    i_w = s * jax.random.normal(ki, w_shape, dtype=jnp.float32)
    j_w = s * jax.random.normal(kj, w_shape, dtype=jnp.float32)
    k_w = s * jax.random.normal(kk, w_shape, dtype=jnp.float32)
    bias = jnp.zeros((out_channels,), dtype=jnp.float32)  # reset_parameters zeros bias
    return r_w, i_w, j_w, k_w, bias


# ---------------------------------------------------------------------------
# Pure-JAX reference (lax conv) for correctness check
# ---------------------------------------------------------------------------
def reference_qconv(x, r_w, i_w, j_w, k_w, bias, stride, padding, dilation):
    cat_r = jnp.concatenate([r_w, -i_w, -j_w, -k_w], axis=1)
    cat_i = jnp.concatenate([i_w,  r_w, -k_w,  j_w], axis=1)
    cat_j = jnp.concatenate([j_w,  k_w,  r_w, -i_w], axis=1)
    cat_k = jnp.concatenate([k_w, -j_w,  i_w,  r_w], axis=1)
    Wfull = jnp.concatenate([cat_r, cat_i, cat_j, cat_k], axis=0)
    y = lax.conv_general_dilated(
        x, Wfull, window_strides=(stride, stride),
        padding=[(padding, padding), (padding, padding)],
        rhs_dilation=(dilation, dilation),
        dimension_numbers=("NCHW", "OIHW", "NCHW"))
    return y + bias.reshape(1, -1, 1, 1)


if __name__ == "__main__":
    # QuaternionConv(in_channels=8, out_channels=8, kernel_size=3, stride=1, padding=1)
    N, Cin, Cout, H, W = 2, 8, 8, 16, 16
    ksize = 3

    key = jax.random.PRNGKey(0)
    kx, kp = jax.random.split(key)
    x = jax.random.normal(kx, (N, Cin, H, W), dtype=jnp.float32)
    r_w, i_w, j_w, k_w, bias = init_params(kp, Cin, Cout, ksize)

    y_ref = reference_qconv(x, r_w, i_w, j_w, k_w, bias, 1, 1, 1)

    # 1) exact-math check: f32 compute path, stride=1 / padding=1 / dilation=1.
    y32 = quaternion_conv2d(x, r_w, i_w, j_w, k_w, bias,
                            stride=1, padding=1, dilation=1,
                            compute_dtype=jnp.float32)
    y32 = jax.block_until_ready(y32)
    assert y32.shape == y_ref.shape == (N, Cout, H, W)
    assert jnp.allclose(y32, y_ref, rtol=1e-4, atol=1e-4), "f32 path mismatch"

    # 2) multi-row-tile path (n_h > 1, bottom output padding), f32.
    y_t = quaternion_conv2d(x, r_w, i_w, j_w, k_w, bias,
                            stride=1, padding=1, dilation=1,
                            compute_dtype=jnp.float32, target_m=96)
    y_t = jax.block_until_ready(y_t)
    assert jnp.allclose(y_t, y_ref, rtol=1e-4, atol=1e-4), "row-tile path mismatch"

    # 3) dilation=2 path (different static tap offsets), f32.
    y_d = quaternion_conv2d(x, r_w, i_w, j_w, k_w, bias,
                            stride=1, padding=2, dilation=2,
                            compute_dtype=jnp.float32)
    y_d = jax.block_until_ready(y_d)
    y_d_ref = reference_qconv(x, r_w, i_w, j_w, k_w, bias, 1, 2, 2)
    assert y_d.shape == y_d_ref.shape
    assert jnp.allclose(y_d, y_d_ref, rtol=1e-4, atol=1e-4), "dilated path mismatch"

    # 4) default bf16 MXU path (f32 accumulation) — looser tolerance.
    y_bf = quaternion_conv2d(x, r_w, i_w, j_w, k_w, bias,
                             stride=1, padding=1, dilation=1)
    y_bf = jax.block_until_ready(y_bf)
    assert jnp.allclose(y_bf, y_ref, rtol=5e-2, atol=5e-2), "bf16 path mismatch"

    print("KERNEL_OK")
</pallas_src>

<mosaic_0001>
module attributes {stable_mosaic.version = 11 : i64} {
  func.func @_qconv_kernel(%arg0: i32, %arg1: i32, %arg2: memref<1x18x18x8xf32, #tpu.memory_space<vmem>>, %arg3: memref<72x128xf32, #tpu.memory_space<vmem>>, %arg4: memref<1x128xf32, #tpu.memory_space<vmem>>, %arg5: memref<1x16x16x128xf32, #tpu.memory_space<vmem>>) attributes {dimension_semantics = [#tpu.dimension_semantics<parallel>, #tpu.dimension_semantics<parallel>], iteration_bounds = array<i64: 2, 1>, scalar_prefetch = 0 : i64, scratch_operands = 0 : i64, tpu.core_type = #tpu.core_type<tc>, window_params = [{transform_indices = @transform_0, window_bounds = array<i64: 1, 18, 18, 8>}, {pipeline_mode = #tpu.pipeline_mode<synchronous>, transform_indices = @transform_1, window_bounds = array<i64: 72, 128>}, {pipeline_mode = #tpu.pipeline_mode<synchronous>, transform_indices = @transform_2, window_bounds = array<i64: 1, 128>}, {transform_indices = @transform_3, window_bounds = array<i64: 1, 16, 16, 128>}]} {
    %c16_i32 = arith.constant 16 : i32
    %0 = arith.muli %arg1, %c16_i32 : i32
    %1 = tpu.assume_multiple %0, 16 : i32
    %c0_i32 = arith.constant 0 : i32
    %2 = arith.addi %1, %c0_i32 : i32
    %c0 = arith.constant 0 : index
    %3 = arith.index_cast %2 : i32 to index
    %c0_0 = arith.constant 0 : index
    %c0_1 = arith.constant 0 : index
    %4 = vector.load %arg2[%c0, %3, %c0_0, %c0_1] : memref<1x18x18x8xf32, #tpu.memory_space<vmem>>, vector<1x16x16x8xf32>
    %5 = vector.shape_cast %4 : vector<1x16x16x8xf32> to vector<16x16x8xf32>
    %c0_2 = arith.constant 0 : index
    %6 = arith.index_cast %2 : i32 to index
    %c1 = arith.constant 1 : index
    %c0_3 = arith.constant 0 : index
    %7 = vector.load %arg2[%c0_2, %6, %c1, %c0_3] : memref<1x18x18x8xf32, #tpu.memory_space<vmem>>, vector<1x16x16x8xf32>
    %8 = vector.shape_cast %7 : vector<1x16x16x8xf32> to vector<16x16x8xf32>
    %c0_4 = arith.constant 0 : index
    %9 = arith.index_cast %2 : i32 to index
    %c2 = arith.constant 2 : index
    %c0_5 = arith.constant 0 : index
    %10 = vector.load %arg2[%c0_4, %9, %c2, %c0_5] : memref<1x18x18x8xf32, #tpu.memory_space<vmem>>, vector<1x16x16x8xf32>
    %11 = vector.shape_cast %10 : vector<1x16x16x8xf32> to vector<16x16x8xf32>
    %c1_i32 = arith.constant 1 : i32
    %12 = arith.addi %1, %c1_i32 : i32
    %c0_6 = arith.constant 0 : index
    %13 = arith.index_cast %12 : i32 to index
    %c0_7 = arith.constant 0 : index
    %c0_8 = arith.constant 0 : index
    %14 = vector.load %arg2[%c0_6, %13, %c0_7, %c0_8] : memref<1x18x18x8xf32, #tpu.memory_space<vmem>>, vector<1x16x16x8xf32>
    %15 = vector.shape_cast %14 : vector<1x16x16x8xf32> to vector<16x16x8xf32>
    %c0_9 = arith.constant 0 : index
    %16 = arith.index_cast %12 : i32 to index
    %c1_10 = arith.constant 1 : index
    %c0_11 = arith.constant 0 : index
    %17 = vector.load %arg2[%c0_9, %16, %c1_10, %c0_11] : memref<1x18x18x8xf32, #tpu.memory_space<vmem>>, vector<1x16x16x8xf32>
    %18 = vector.shape_cast %17 : vector<1x16x16x8xf32> to vector<16x16x8xf32>
    %c0_12 = arith.constant 0 : index
    %19 = arith.index_cast %12 : i32 to index
    %c2_13 = arith.constant 2 : index
    %c0_14 = arith.constant 0 : index
    %20 = vector.load %arg2[%c0_12, %19, %c2_13, %c0_14] : memref<1x18x18x8xf32, #tpu.memory_space<vmem>>, vector<1x16x16x8xf32>
    %21 = vector.shape_cast %20 : vector<1x16x16x8xf32> to vector<16x16x8xf32>
    %c2_i32 = arith.constant 2 : i32
    %22 = arith.addi %1, %c2_i32 : i32
    %c0_15 = arith.constant 0 : index
    %23 = arith.index_cast %22 : i32 to index
    %c0_16 = arith.constant 0 : index
    %c0_17 = arith.constant 0 : index
    %24 = vector.load %arg2[%c0_15, %23, %c0_16, %c0_17] : memref<1x18x18x8xf32, #tpu.memory_space<vmem>>, vector<1x16x16x8xf32>
    %25 = vector.shape_cast %24 : vector<1x16x16x8xf32> to vector<16x16x8xf32>
    %c0_18 = arith.constant 0 : index
    %26 = arith.index_cast %22 : i32 to index
    %c1_19 = arith.constant 1 : index
    %c0_20 = arith.constant 0 : index
    %27 = vector.load %arg2[%c0_18, %26, %c1_19, %c0_20] : memref<1x18x18x8xf32, #tpu.memory_space<vmem>>, vector<1x16x16x8xf32>
    %28 = vector.shape_cast %27 : vector<1x16x16x8xf32> to vector<16x16x8xf32>
    %c0_21 = arith.constant 0 : index
    %29 = arith.index_cast %22 : i32 to index
    %c2_22 = arith.constant 2 : index
    %c0_23 = arith.constant 0 : index
    %30 = vector.load %arg2[%c0_21, %29, %c2_22, %c0_23] : memref<1x18x18x8xf32, #tpu.memory_space<vmem>>, vector<1x16x16x8xf32>
    %31 = vector.shape_cast %30 : vector<1x16x16x8xf32> to vector<16x16x8xf32>
    %32 = tpu.concatenate %5, %8, %11, %15, %18, %21, %25, %28, %31 in 2 : vector<16x16x8xf32>, vector<16x16x8xf32>, vector<16x16x8xf32>, vector<16x16x8xf32>, vector<16x16x8xf32>, vector<16x16x8xf32>, vector<16x16x8xf32>, vector<16x16x8xf32>, vector<16x16x8xf32> -> vector<16x16x72xf32>
    %33 = vector.shape_cast %32 : vector<16x16x72xf32> to vector<256x72xf32>
    %c0_24 = arith.constant 0 : index
    %c0_25 = arith.constant 0 : index
    %34 = vector.load %arg3[%c0_24, %c0_25] : memref<72x128xf32, #tpu.memory_space<vmem>>, vector<72x128xf32>
    %cst = arith.constant dense<0.000000e+00> : vector<256x128xf32>
    %35 = tpu.matmul %33, %34, %cst {dimension_numbers = #tpu.dot_dimension_numbers<[1], [0], [0], [1], [0, 0, 1, 1], [], []>} : vector<256x72xf32>, vector<72x128xf32>, vector<256x128xf32> -> vector<256x128xf32>
    %c0_26 = arith.constant 0 : index
    %c0_27 = arith.constant 0 : index
    %36 = vector.load %arg4[%c0_26, %c0_27] : memref<1x128xf32, #tpu.memory_space<vmem>>, vector<1x128xf32>
    %37 = vector.broadcast %36 : vector<1x128xf32> to vector<256x128xf32>
    %38 = arith.addf %35, %37 : vector<256x128xf32>
    %39 = vector.shape_cast %38 : vector<256x128xf32> to vector<1x16x16x128xf32>
    %c0_28 = arith.constant 0 : index
    %c0_29 = arith.constant 0 : index
    %c0_30 = arith.constant 0 : index
    %c0_31 = arith.constant 0 : index
    %40 = vector.load %arg5[%c0_28, %c0_29, %c0_30, %c0_31] : memref<1x16x16x128xf32, #tpu.memory_space<vmem>>, vector<1x16x16x128xf32>
    tpu.vector_store %arg5[%c0_28, %c0_29, %c0_30, %c0_31], %39 {strides = array<i32>} : memref<1x16x16x128xf32, #tpu.memory_space<vmem>>, vector<1x16x16x128xf32>,
    return
  }
  func.func @transform_0(%arg0: i32, %arg1: i32) -> (i32, i32, i32, i32) {
    %c0_i32 = arith.constant 0 : i32
    %c0_i32_0 = arith.constant 0 : i32
    %c0_i32_1 = arith.constant 0 : i32
    %c0_i32_2 = arith.constant 0 : i32
    return %arg0, %c0_i32, %c0_i32_0, %c0_i32_1 : i32, i32, i32, i32
  }
  func.func @transform_1(%arg0: i32, %arg1: i32) -> (i32, i32) {
    %c0_i32 = arith.constant 0 : i32
    %c0_i32_0 = arith.constant 0 : i32
    %c0_i32_1 = arith.constant 0 : i32
    return %c0_i32, %c0_i32_0 : i32, i32
  }
  func.func @transform_2(%arg0: i32, %arg1: i32) -> (i32, i32) {
    %c0_i32 = arith.constant 0 : i32
    %c0_i32_0 = arith.constant 0 : i32
    %c0_i32_1 = arith.constant 0 : i32
    return %c0_i32, %c0_i32_0 : i32, i32
  }
  func.func @transform_3(%arg0: i32, %arg1: i32) -> (i32, i32, i32, i32) {
    %c0_i32 = arith.constant 0 : i32
    %c0_i32_0 = arith.constant 0 : i32
    %c0_i32_1 = arith.constant 0 : i32
    return %arg0, %arg1, %c0_i32, %c0_i32_0 : i32, i32, i32, i32
  }
}

</mosaic_0001>

<bundles_post_ra>
// kernel: tpu_custom_call.1
= control target key start
LH: loop header
LB: loop body
LE: loop exit
PB: predicated region body
PF: predicated region fallthrough
CT: control target
= control target key end

     0   :  { %8 = vsyncpa [#allocation3], 0  ;;  %s4358_s0 = inlined_call_operand.vmem [shape: f32[2,18,18,8], index: 0, kind: input, shape index: {}]   ;;  %s4359_s1 = inlined_call_operand.vmem [shape: f32[72,128], index: 1, kind: input, shape index: {}]   ;;  %s4360_s2 = inlined_call_operand.vmem [shape: f32[1,128], index: 2, kind: input, shape index: {}]   ;;  %s4361_s3 = inlined_call_operand.hbm [shape: f32[2,16,16,128], index: 3, kind: output, shape index: {}]  }
   0x1   :  { %10 = vsyncpa [#allocation3 + $0x1], 0  ;;  %s2776_s12 = smov 0   ;;  %s2778_s13 = smov 0  }
   0x2   :  { %s2780_s14 = smov 0   ;;  %s2782_s15 = smov 0  }
   0x3   :  { %s2784_s16 = smov 0   ;;  %s2786_s17 = smov 0  }
   0x4 LB: > { %s2239_s18 = sadd.s32 4294967295, %s2744_s17   ;;  %s2240_s19 = sadd.s32 4294967294, %s2744_s17   ;;  %s2744_s17 = sphi %s2786_s17, %s16_s17   ;;  %s2740_s16 = sphi %s2784_s16, %s4520_s16   ;;  %s2736_s15 = sphi %s2782_s15, %s4519_s15   ;;  %s2732_s14 = sphi %s2780_s14, %s4518_s14   ;;  %s2728_s13 = sphi %s2778_s13, %s4517_s13   ;;  %s2724_s12 = sphi %s2776_s12, %s4516_s12  }
   0x5   : > { %s28_s20 = sadd.s32 1, %s2740_s16  ;;  %s105_s21 = sadd.s32 1, %s2732_s14 }
   0x6   : > { %p30_p0 = scmp.ge.s32.totalorder %s28_s20, 2  ;;  %p115_p1 = scmp.ne.s32.totalorder %s2732_s14, %s2728_s13 }
   0x7   : > { %p116_p2 = scmp.eq.s32.totalorder %s2239_s18, 1  ;;  %p121_p3 = scmp.ne.s32.totalorder %s2728_s13, %s2724_s12 }
   0x8   : > { %s4522_s20 = smov (%p30_p0, %s28_s20), 0  ;;  %p122_p5 = scmp.eq.s32.totalorder %s2240_s19, 1 }
   0x9   : > { %p2816_p4 = por %p116_p2, %p115_p1  ;;  %s100_s23 = ssub.s32 %s2740_s16, %s4522_s20 }
   0xa   : > { %p2243_p6 = scmp.ge.s32.totalorder %s2744_s17, 1  ;;  %p103_p7 = scmp.eq.s32.totalorder %s100_s23, 0 }
   0xb   : > { %p2823_p8 = por %p122_p5, %p121_p3  ;;  %p154_p9 = scmp.lt.s32.totalorder %s2744_s17, 3 }
   0xc   : > { %s2829_s25 = scalar_select %p103_p7, %s2732_s14, %s105_s21  }
   0xd   : > { %p155_p10 = pnand %p2243_p6, %p154_p9 }
   0xf   : > { %158 = sbr.rel (%p155_p10) target bundleno = 863 (0x35f), region = 32 }
  0x14   : > { %p178_p11 = scmp.lt.s32.totalorder %s2736_s15, 1  ;;  %s2746_s4 = smov 8   ;;  %vm1505_vm0 = vcmask 64512   ;;  %vm1538_vm1 = vcmask 130048   ;;  %vm1571_vm2 = vcmask 195584   ;;  %vm1604_vm3 = vcmask 261120  }
  0x15   : > { %s2747_s5 = smov 16   ;;  %s2748_s6 = smov 24   ;;  %vm1637_vm4 = vcmask 326656   ;;  %vm1670_vm5 = vcmask 392192   ;;  %vm1703_vm6 = vcmask 457728   ;;  %vm1736_vm7 = vcmask 523264  }
  0x16   : > { %s179_s26 = scalar_select %p178_p11, %s2736_s15, 1  ;;  %vm1785_vm8 = vcmask 588800  }
  0x17   : > { %s2749_s7 = smov 32   ;;  %s2750_s8 = smov 40  }
  0x18   : > { %s2602_s27 = smul.u32 432, %s179_s26  ;;  %s2751_s19 = smov 48  }
  0x19   : > { %s2476_s29 = sshll.u32 %s2736_s15, 12  ;;  %s2754_s18 = smov [#allocation2]  }
  0x1a   : > { %s2836_s30 = scalar_lea.vmem %s4358_s0, %s2602_s27  ;;  %s2753_s27 = smov 64  }
  0x1b   : > { %v2839_v0 = vld [vmem:[%s2836_s30 + $0x19] sm:$0xff]  ;;  %v219_v1 = vld [vmem:[%s2836_s30 + $0x1] sm:$0xff]  ;;  %v220_v3 = vld [vmem:[%s2836_s30 + $0x9] sm:$0xff]  ;;  %s4300_s10 = scalar_lea.hbm %s4361_s3, %s2476_s29  ;;  %s2672_s21 = sshll.u32 %s2754_s18, 4  ;;  %s2673_s21 = int_to_ptr.vmem [resolvable:$false] %s2672_s21 }
  0x1c   : > { %517 = vrot.lane.b32.xlu1 %v2839_v0, %s2746_s4  ;;  %513 = vrot.lane.b32.xlu0 %v219_v1, %s2746_s4  ;;  %v2846_v2 = vld [vmem:[%s2836_s30 + $0x21] sm:$0xff]  ;;  %v2853_v4 = vld [vmem:[%s2836_s30 + $0x39] sm:$0xff]  ;;  %s2674_s23 = scalar_lea.vmem %s2673_s21, 8192 }
  0x1d   : > { %v2856_v5 = vld [vmem:[%s2836_s30 + $0x31] sm:$0xff]  ;;  %v2866_v7 = vld [vmem:[%s2836_s30 + $0x49] sm:$0xff]  ;;  %v2876_v9 = vld [vmem:[%s2836_s30 + $0x61] sm:$0xff] }
  0x1e   : > { %v2863_v6 = vld [vmem:[%s2836_s30 + $0x51] sm:$0xff]  ;;  %v2873_v8 = vld [vmem:[%s2836_s30 + $0x69] sm:$0xff]  ;;  %v2883_v10 = vld [vmem:[%s2836_s30 + $0x81] sm:$0xff] }
  0x1f   : > { %v2886_v11 = vld [vmem:[%s2836_s30 + $0x79] sm:$0xff]  ;;  %v2896_v13 = vld [vmem:[%s2836_s30 + $0x91] sm:$0xff]  ;;  %v2906_v15 = vld [vmem:[%s2836_s30 + $0xa9] sm:$0xff] }
  0x20   : > { %519 = vrot.lane.b32.xlu1 %v2846_v2, %s2746_s4  ;;  %515 = vrot.lane.b32.xlu0 %v220_v3, %s2746_s4  ;;  %v2893_v12 = vld [vmem:[%s2836_s30 + $0x99] sm:$0xff]  ;;  %v2903_v14 = vld [vmem:[%s2836_s30 + $0xb1] sm:$0xff] }
  0x21   : > { %v236_v16 = vld [vmem:[%s2836_s30 + $0xc9] sm:$0xff]  ;;  %v2914_v17 = vld [vmem:[%s2836_s30 + $0xc1] sm:$0xff]  ;;  %v2923_v19 = vld [vmem:[%s2836_s30 + $0xd9] sm:$0xff] }
  0x22   : > { %v2920_v18 = vld [vmem:[%s2836_s30 + $0xe1] sm:$0xff]  ;;  %v2930_v20 = vld [vmem:[%s2836_s30 + $0xf9] sm:$0xff]  ;;  %v2933_v21 = vld [vmem:[%s2836_s30 + $0xf1] sm:$0xff] }
  0x23   : > { %4404 = vst [vmem:[#allocation5_spill] sm:$0xff] %v2930_v20  ;;  %4405 = vst [vmem:[#allocation6_spill] sm:$0xff] %v2933_v21  ;;  %v2940_v22 = vld [vmem:[%s2836_s30 + $0x111] sm:$0xff]  ;;  %v2943_v23 = vld [vmem:[%s2836_s30 + $0x109] sm:$0xff] }
  0x24   : > { %523 = vrot.lane.b32.xlu1 %v2853_v4, %s2746_s4  ;;  %521 = vrot.lane.b32.xlu0 %v2856_v5, %s2746_s4  ;;  %4406 = vst [vmem:[#allocation7_spill] sm:$0xff] %v2940_v22  ;;  %4407 = vst [vmem:[#allocation8_spill] sm:$0xff] %v2943_v23  ;;  %v244_v24 = vld [vmem:[%s2836_s30 + $0x129] sm:$0xff]  ;;  %v243_v25 = vld [vmem:[%s2836_s30 + $0x121] sm:$0xff] }
  0x25   : > { %v246_v26 = vld [vmem:[%s2836_s30 + $0x141] sm:$0xff]  ;;  %v245_v27 = vld [vmem:[%s2836_s30 + $0x139] sm:$0xff]  ;;  %v247_v29 = vld [vmem:[%s2836_s30 + $0x151] sm:$0xff] }
  0x26   : > { %v248_v28 = vld [vmem:[%s2836_s30 + $0x159] sm:$0xff]  ;;  %v250_v30 = vld [vmem:[%s2836_s30 + $0x171] sm:$0xff]  ;;  %v249_v31 = vld [vmem:[%s2836_s30 + $0x169] sm:$0xff] }
  0x27   : > { %v252_v32 = vld [vmem:[%s2836_s30 + $0xa] sm:$0xff]  ;;  %v251_v33 = vld [vmem:[%s2836_s30 + $0x2] sm:$0xff]  ;;  %v2973_v35 = vld [vmem:[%s2836_s30 + $0x1a] sm:$0xff] }
  0x28   : > { %527 = vrot.lane.b32.xlu1 %v2863_v6, %s2746_s4  ;;  %525 = vrot.lane.b32.xlu0 %v2866_v7, %s2746_s4  ;;  %v2970_v34 = vld [vmem:[%s2836_s30 + $0x22] sm:$0xff]  ;;  %v2980_v36 = vld [vmem:[%s2836_s30 + $0x3a] sm:$0xff] }
  0x29   : > { %4408 = vst [vmem:[#allocation9_spill] sm:$0xff] %v2980_v36  ;;  %v2983_v37 = vld [vmem:[%s2836_s30 + $0x32] sm:$0xff]  ;;  %v2993_v39 = vld [vmem:[%s2836_s30 + $0x4a] sm:$0xff]  ;;  %v3001_v41 = vld [vmem:[%s2836_s30 + $0x62] sm:$0xff] }
  0x2a   : > { %4409 = vst [vmem:[#allocation10_spill] sm:$0xff] %v2983_v37  ;;  %v2990_v38 = vld [vmem:[%s2836_s30 + $0x52] sm:$0xff]  ;;  %4411 = vst [vmem:[#allocation12_spill] sm:$0xff] %v2993_v39  ;;  %v260_v40 = vld [vmem:[%s2836_s30 + $0x6a] sm:$0xff] }
  0x2b   : > { %4410 = vst [vmem:[#allocation11_spill] sm:$0xff] %v2990_v38  ;;  %4412 = vst [vmem:[#allocation13_spill] sm:$0xff] %v3001_v41  ;;  %v262_v42 = vld [vmem:[%s2836_s30 + $0x82] sm:$0xff]  ;;  %v261_v43 = vld [vmem:[%s2836_s30 + $0x7a] sm:$0xff] }
  0x2c   : > { %531 = vrot.lane.b32.xlu1 %v2873_v8, %s2746_s4  ;;  %529 = vrot.lane.b32.xlu0 %v2876_v9, %s2746_s4  ;;  %v264_v44 = vld [vmem:[%s2836_s30 + $0x9a] sm:$0xff]  ;;  %v263_v45 = vld [vmem:[%s2836_s30 + $0x92] sm:$0xff] }
  0x2d   : > { %v266_v46 = vld [vmem:[%s2836_s30 + $0xb2] sm:$0xff]  ;;  %v265_v47 = vld [vmem:[%s2836_s30 + $0xaa] sm:$0xff]  ;;  %v267_v49 = vld [vmem:[%s2836_s30 + $0xc2] sm:$0xff] }
  0x2e   : > { %v268_v48 = vld [vmem:[%s2836_s30 + $0xca] sm:$0xff]  ;;  %v3023_v50 = vld [vmem:[%s2836_s30 + $0xe2] sm:$0xff]  ;;  %v3026_v51 = vld [vmem:[%s2836_s30 + $0xda] sm:$0xff] }
  0x2f   : > { %4413 = vst [vmem:[#allocation14_spill] sm:$0xff] %v3023_v50  ;;  %v3033_v52 = vld [vmem:[%s2836_s30 + $0xfa] sm:$0xff]  ;;  %v3036_v53 = vld [vmem:[%s2836_s30 + $0xf2] sm:$0xff]  ;;  %v3046_v55 = vld [vmem:[%s2836_s30 + $0x10a] sm:$0xff] }
  0x30   : > { %535 = vrot.lane.b32.xlu1 %v2883_v10, %s2746_s4  ;;  %533 = vrot.lane.b32.xlu0 %v2886_v11, %s2746_s4  ;;  %4414 = vst [vmem:[#allocation15_spill] sm:$0xff] %v3033_v52  ;;  %4415 = vst [vmem:[#allocation16_spill] sm:$0xff] %v3036_v53  ;;  %v3043_v54 = vld [vmem:[%s2836_s30 + $0x112] sm:$0xff]  ;;  %v3053_v56 = vld [vmem:[%s2836_s30 + $0x12a] sm:$0xff] }
  0x31   : > { %4416 = vst [vmem:[#allocation17_spill] sm:$0xff] %v3043_v54  ;;  %4417 = vst [vmem:[#allocation18_spill] sm:$0xff] %v3046_v55  ;;  %v3056_v57 = vld [vmem:[%s2836_s30 + $0x122] sm:$0xff]  ;;  %v277_v59 = vld [vmem:[%s2836_s30 + $0x13a] sm:$0xff] }
  0x32   : > { %4418 = vst [vmem:[#allocation19_spill] sm:$0xff] %v3053_v56  ;;  %4419 = vst [vmem:[#allocation20_spill] sm:$0xff] %v3056_v57  ;;  %v278_v58 = vld [vmem:[%s2836_s30 + $0x142] sm:$0xff]  ;;  %v280_v62 = vld [vmem:[%s2836_s30 + $0x15a] sm:$0xff] }
  0x33   : > { %v279_v63 = vld [vmem:[%s2836_s30 + $0x152] sm:$0xff] }
  0x34   : > { %539 = vrot.lane.b32.xlu1 %v2893_v12, %s2746_s4  ;;  %537 = vrot.lane.b32.xlu0 %v2896_v13, %s2746_s4 }
  0x38   : > { %543 = vrot.lane.b32.xlu1 %v2903_v14, %s2746_s4  ;;  %541 = vrot.lane.b32.xlu0 %v2906_v15, %s2746_s4 }
  0x3c   : > { %547 = vrot.lane.b32.xlu1 %v236_v16, %s2746_s4  ;;  %545 = vrot.lane.b32.xlu0 %v2914_v17, %s2746_s4  ;;  %v282_v16 = vld [vmem:[%s2836_s30 + $0x172] sm:$0xff] }
  0x40   : > { %551 = vrot.lane.b32.xlu1 %v2920_v18, %s2746_s4  ;;  %549 = vrot.lane.b32.xlu0 %v2923_v19, %s2746_s4 }
  0x44   : > { %555 = vrot.lane.b32.xlu1 %v2930_v20, %s2746_s4  ;;  %553 = vrot.lane.b32.xlu0 %v2933_v21, %s2746_s4  ;;  %v3249_v20 = vld [vmem:[%s2836_s30 + $0x138] sm:$0xff] }
  0x48   : > { %559 = vrot.lane.b32.xlu1 %v2940_v22, %s2746_s4  ;;  %557 = vrot.lane.b32.xlu0 %v2943_v23, %s2746_s4  ;;  %v3237_v22 = vld [vmem:[%s2836_s30 + $0x120] sm:$0xff]  ;;  %v218_v23 = vld [vmem:[%s2836_s30 + $0x170] sm:$0xff] }
  0x4c   : > { %563 = vrot.lane.b32.xlu1 %v244_v24, %s2746_s4  ;;  %561 = vrot.lane.b32.xlu0 %v243_v25, %s2746_s4  ;;  %v281_v24 = vld [vmem:[%s2836_s30 + $0x16a] sm:$0xff] }
  0x50   : > { %567 = vrot.lane.b32.xlu1 %v246_v26, %s2746_s4  ;;  %565 = vrot.lane.b32.xlu0 %v245_v27, %s2746_s4 }
  0x54   : > { %571 = vrot.lane.b32.xlu1 %v248_v28, %s2746_s4  ;;  %569 = vrot.lane.b32.xlu0 %v247_v29, %s2746_s4  ;;  %v3091_v29 = vld [vmem:[%s2836_s30 + $0x18] sm:$0xff] }
  0x55   : > { %4424 = vst [vmem:[#allocation25_spill] sm:$0xff] %v3091_v29 }
  0x58   : > { %575 = vrot.lane.b32.xlu1 %v250_v30, %s2746_s4  ;;  %573 = vrot.lane.b32.xlu0 %v249_v31, %s2746_s4  ;;  %v190_v30 = vld [vmem:[%s2836_s30 + $0x20] sm:$0xff] }
  0x5c   : > { %643 = vrot.lane.b32.xlu1 %v252_v32, %s2747_s5  ;;  %641 = vrot.lane.b32.xlu0 %v251_v33, %s2747_s5  ;;  %v3102_v33 = vld [vmem:[%s2836_s30 + $0x38] sm:$0xff] }
  0x60   : > { %647 = vrot.lane.b32.xlu1 %v2970_v34, %s2747_s5  ;;  %645 = vrot.lane.b32.xlu0 %v2973_v35, %s2747_s5 }
  0x64   : > { %651 = vrot.lane.b32.xlu1 %v2980_v36, %s2747_s5  ;;  %649 = vrot.lane.b32.xlu0 %v2983_v37, %s2747_s5 }
  0x68   : > { %655 = vrot.lane.b32.xlu1 %v2990_v38, %s2747_s5  ;;  %653 = vrot.lane.b32.xlu0 %v2993_v39, %s2747_s5 }
  0x6c   : > { %659 = vrot.lane.b32.xlu1 %v260_v40, %s2747_s5  ;;  %657 = vrot.lane.b32.xlu0 %v3001_v41, %s2747_s5  ;;  %v3105_v40 = vld [vmem:[%s2836_s30 + $0x30] sm:$0xff]  ;;  %v3181_v41 = vld [vmem:[%s2836_s30 + $0xc0] sm:$0xff] }
  0x6d   : > { %4430 = vst [vmem:[#allocation31_spill] sm:$0xff] %v3181_v41 }
  0x70   : > { %663 = vrot.lane.b32.xlu1 %v262_v42, %s2747_s5  ;;  %661 = vrot.lane.b32.xlu0 %v261_v43, %s2747_s5 }
  0x74   : > { %667 = vrot.lane.b32.xlu1 %v264_v44, %s2747_s5  ;;  %665 = vrot.lane.b32.xlu0 %v263_v45, %s2747_s5  ;;  %v3116_v44 = vld [vmem:[%s2836_s30 + $0x50] sm:$0xff]  ;;  %v3119_v45 = vld [vmem:[%s2836_s30 + $0x48] sm:$0xff] }
  0x78   : > { %671 = vrot.lane.b32.xlu1 %v266_v46, %s2747_s5  ;;  %669 = vrot.lane.b32.xlu0 %v265_v47, %s2747_s5  ;;  %v200_v46 = vld [vmem:[%s2836_s30 + $0x98] sm:$0xff]  ;;  %v199_v47 = vld [vmem:[%s2836_s30 + $0x90] sm:$0xff] }
  0x7c   : > { %675 = vrot.lane.b32.xlu1 %v268_v48, %s2747_s5  ;;  %673 = vrot.lane.b32.xlu0 %v267_v49, %s2747_s5 }
  0x80   : > { %679 = vrot.lane.b32.xlu1 %v3023_v50, %s2747_s5  ;;  %677 = vrot.lane.b32.xlu0 %v3026_v51, %s2747_s5 }
  0x84   : > { %683 = vrot.lane.b32.xlu1 %v3033_v52, %s2747_s5  ;;  %681 = vrot.lane.b32.xlu0 %v3036_v53, %s2747_s5  ;;  %v217_v52 = vld [vmem:[%s2836_s30 + $0x168] sm:$0xff]  ;;  %v3246_v53 = vld [vmem:[%s2836_s30 + $0x140] sm:$0xff] }
  0x88   : > { %687 = vrot.lane.b32.xlu1 %v3043_v54, %s2747_s5  ;;  %685 = vrot.lane.b32.xlu0 %v3046_v55, %s2747_s5  ;;  %v3223_v54 = vld [vmem:[%s2836_s30 + $0x108] sm:$0xff] }
  0x89   : > { %v3234_v55 = vld [vmem:[%s2836_s30 + $0x128] sm:$0xff] }
  0x8c   : > { %691 = vrot.lane.b32.xlu1 %v3053_v56, %s2747_s5  ;;  %689 = vrot.lane.b32.xlu0 %v3056_v57, %s2747_s5  ;;  %v3220_v57 = vld [vmem:[%s2836_s30 + $0x110] sm:$0xff] }
  0x8e   : > { %v3064_v60 = vpop.permute.xlu1 %517  ;;  %v3066_v61 = vpop.permute.xlu0 %513 }
  0x8f   : > { %4420 = vst [vmem:[#allocation21_spill] sm:$0xff] %v3064_v60  ;;  %4421 = vst [vmem:[#allocation22_spill] sm:$0xff] %v3066_v61  ;;  %v3149_v60 = vld [vmem:[%s2836_s30 + $0x78] sm:$0xff] }
  0x90   : > { %695 = vrot.lane.b32.xlu1 %v278_v58, %s2747_s5  ;;  %693 = vrot.lane.b32.xlu0 %v277_v59, %s2747_s5  ;;  %v3128_v58 = vld [vmem:[%s2836_s30 + $0x68] sm:$0xff]  ;;  %v3131_v59 = vld [vmem:[%s2836_s30 + $0x60] sm:$0xff] }
  0x92   : > { %v3072_v1 = vpop.permute.xlu1 %519  ;;  %v3074_v3 = vpop.permute.xlu0 %515 }
  0x93   : > { %4422 = vst [vmem:[#allocation23_spill] sm:$0xff] %v3072_v1  ;;  %4423 = vst [vmem:[#allocation24_spill] sm:$0xff] %v3074_v3 }
  0x94   : > { %699 = vrot.lane.b32.xlu1 %v280_v62, %s2747_s5  ;;  %697 = vrot.lane.b32.xlu0 %v279_v63, %s2747_s5 }
  0x96   : > { %v3080_v25 = vpop.permute.xlu1 %523  ;;  %v3082_v26 = vpop.permute.xlu0 %521 }
  0x98   : > { %703 = vrot.lane.b32.xlu1 %v282_v16, %s2747_s5  ;;  %701 = vrot.lane.b32.xlu0 %v281_v24, %s2747_s5  ;;  %v202_v16 = vld [vmem:[%s2836_s30 + $0xb0] sm:$0xff]  ;;  %v201_v24 = vld [vmem:[%s2836_s30 + $0xa8] sm:$0xff]  ;;  %s2752_s5 = smov 56  }
  0x9a   : > { %v3086_v27 = vpop.permute.xlu1 %527  ;;  %v3088_v28 = vpop.permute.xlu0 %525 }
  0x9c   : > { %771 = vrot.lane.b32.xlu1 %v190_v30, %s2748_s6  ;;  %769 = vrot.lane.b32.xlu0 %v3091_v29, %s2748_s6  ;;  %v3146_v29 = vld [vmem:[%s2836_s30 + $0x80] sm:$0xff] }
  0x9e   : > { %v3097_v31 = vpop.permute.xlu1 %531  ;;  %v3099_v32 = vpop.permute.xlu0 %529 }
  0xa0   : > { %775 = vrot.lane.b32.xlu1 %v3102_v33, %s2748_s6  ;;  %773 = vrot.lane.b32.xlu0 %v3105_v40, %s2748_s6 }
  0xa2   : > { %v3111_v42 = vpop.permute.xlu1 %535  ;;  %v3113_v43 = vpop.permute.xlu0 %533 }
  0xa4   : > { %779 = vrot.lane.b32.xlu1 %v3116_v44, %s2748_s6  ;;  %777 = vrot.lane.b32.xlu0 %v3119_v45, %s2748_s6 }
  0xa6   : > { %v540_v48 = vpop.permute.xlu1 %539  ;;  %v538_v49 = vpop.permute.xlu0 %537 }
  0xa7   : > { %v3134_v62 = vsel %vm1505_vm0, %v200_v46, %v540_v48  ;;  %v3137_v63 = vsel %vm1505_vm0, %v199_v47, %v538_v49 }
  0xa8   : > { %783 = vrot.lane.b32.xlu1 %v3128_v58, %s2748_s6  ;;  %781 = vrot.lane.b32.xlu0 %v3131_v59, %s2748_s6 }
  0xaa   : > { %v544_v30 = vpop.permute.xlu1 %543  ;;  %v542_v1 = vpop.permute.xlu0 %541 }
  0xab   : > { %v3152_v48 = vsel %vm1505_vm0, %v202_v16, %v544_v30  ;;  %v3155_v49 = vsel %vm1505_vm0, %v201_v24, %v542_v1 }
  0xac   : > { %787 = vrot.lane.b32.xlu1 %v3146_v29, %s2748_s6  ;;  %785 = vrot.lane.b32.xlu0 %v3149_v60, %s2748_s6 }
  0xae   : > { %v3161_v3 = vpop.permute.xlu1 %547  ;;  %v3163_v61 = vpop.permute.xlu0 %545 }
  0xaf   : > { %4425 = vst [vmem:[#allocation26_spill] sm:$0xff] %v3161_v3  ;;  %4426 = vst [vmem:[#allocation27_spill] sm:$0xff] %v3163_v61  ;;  %v3178_v61 = vld [vmem:[%s2836_s30 + $0xc8] sm:$0xff] }
  0xb0   : > { %791 = vrot.lane.b32.xlu1 %v200_v46, %s2748_s6  ;;  %789 = vrot.lane.b32.xlu0 %v199_v47, %s2748_s6  ;;  %4429 = vst [vmem:[#allocation30_spill] sm:$0xff] %v3178_v61 }
  0xb2   : > { %v3167_v30 = vpop.permute.xlu1 %551  ;;  %v3169_v1 = vpop.permute.xlu0 %549 }
  0xb3   : > { %4427 = vst [vmem:[#allocation28_spill] sm:$0xff] %v3167_v30  ;;  %4428 = vst [vmem:[#allocation29_spill] sm:$0xff] %v3169_v1 }
  0xb4   : > { %795 = vrot.lane.b32.xlu1 %v202_v16, %s2748_s6  ;;  %793 = vrot.lane.b32.xlu0 %v201_v24, %s2748_s6  ;;  %v3192_v16 = vld [vmem:[%s2836_s30 + $0xe0] sm:$0xff]  ;;  %v3195_v24 = vld [vmem:[%s2836_s30 + $0xd8] sm:$0xff] }
  0xb5   : > { %4431 = vst [vmem:[#allocation32_spill] sm:$0xff] %v3192_v16  ;;  %4432 = vst [vmem:[#allocation33_spill] sm:$0xff] %v3195_v24 }
  0xb6   : > { %v3173_v56 = vpop.permute.xlu1 %555  ;;  %v3175_v3 = vpop.permute.xlu0 %553 }
  0xb8   : > { %799 = vrot.lane.b32.xlu1 %v3178_v61, %s2748_s6  ;;  %797 = vrot.lane.b32.xlu0 %v3181_v41, %s2748_s6  ;;  %v3206_v61 = vld [vmem:[%s2836_s30 + $0xf8] sm:$0xff]  ;;  %v3209_v41 = vld [vmem:[%s2836_s30 + $0xf0] sm:$0xff] }
  0xba   : > { %v3187_v46 = vpop.permute.xlu1 %559  ;;  %v3189_v47 = vpop.permute.xlu0 %557 }
  0xbc   : > { %803 = vrot.lane.b32.xlu1 %v3192_v16, %s2748_s6  ;;  %801 = vrot.lane.b32.xlu0 %v3195_v24, %s2748_s6 }
  0xbe   : > { %v3201_v30 = vpop.permute.xlu1 %563  ;;  %v3203_v1 = vpop.permute.xlu0 %561 }
  0xc0   : > { %807 = vrot.lane.b32.xlu1 %v3206_v61, %s2748_s6  ;;  %805 = vrot.lane.b32.xlu0 %v3209_v41, %s2748_s6 }
  0xc2   : > { %v3215_v16 = vpop.permute.xlu1 %567  ;;  %v3217_v24 = vpop.permute.xlu0 %565 }
  0xc3   : > { %4433 = vst [vmem:[#allocation34_spill] sm:$0xff] %v3215_v16  ;;  %4434 = vst [vmem:[#allocation35_spill] sm:$0xff] %v3217_v24  ;;  %v3266_v24 = vld [vmem:[%s2836_s30 + $0x158] sm:$0xff]  ;;  %v3269_v16 = vld [vmem:[%s2836_s30 + $0x150] sm:$0xff] }
  0xc4   : > { %811 = vrot.lane.b32.xlu1 %v3220_v57, %s2748_s6  ;;  %809 = vrot.lane.b32.xlu0 %v3223_v54, %s2748_s6  ;;  %4441 = vst [vmem:[#allocation42_spill] sm:$0xff] %v3266_v24  ;;  %4442 = vst [vmem:[#allocation43_spill] sm:$0xff] %v3269_v16 }
  0xc6   : > { %v3229_v38 = vpop.permute.xlu1 %571  ;;  %v3231_v39 = vpop.permute.xlu0 %569 }
  0xc7   : > { %4435 = vst [vmem:[#allocation36_spill] sm:$0xff] %v3229_v38  ;;  %4436 = vst [vmem:[#allocation37_spill] sm:$0xff] %v3231_v39 }
  0xc8   : > { %815 = vrot.lane.b32.xlu1 %v3234_v55, %s2748_s6  ;;  %813 = vrot.lane.b32.xlu0 %v3237_v22, %s2748_s6 }
  0xca   : > { %v576_v36 = vpop.permute.xlu1 %575  ;;  %v574_v37 = vpop.permute.xlu0 %573 }
  0xcb   : > { %v3252_v21 = vsel %vm1505_vm0, %v218_v23, %v576_v36  ;;  %v3255_v39 = vsel %vm1505_vm0, %v217_v52, %v574_v37 }
  0xcc   : > { %4437 = vst [vmem:[#allocation38_spill] sm:$0xff] %v3252_v21  ;;  %4438 = vst [vmem:[#allocation39_spill] sm:$0xff] %v3255_v39  ;;  %819 = vrot.lane.b32.xlu1 %v3246_v53, %s2748_s6  ;;  %817 = vrot.lane.b32.xlu0 %v3249_v20, %s2748_s6  ;;  %v1511_v39 = vsel %vm1505_vm0, %v3102_v33, %v3080_v25  ;;  %v1510_v21 = vsel %vm1505_vm0, %v3105_v40, %v3082_v26 }
  0xcd   : > { %v1512_v25 = vsel %vm1505_vm0, %v3119_v45, %v3088_v28 }
  0xce   : > { %v3261_v38 = vpop.permute.xlu1 %643  ;;  %v3263_v50 = vpop.permute.xlu0 %641 }
  0xcf   : > { %4439 = vst [vmem:[#allocation40_spill] sm:$0xff] %v3261_v38  ;;  %4440 = vst [vmem:[#allocation41_spill] sm:$0xff] %v3263_v50  ;;  %v2277_v38 = vld [vmem:[%s2836_s30 + $0x188] sm:$0xff]  ;;  %v2276_v50 = vld [vmem:[%s2836_s30 + $0x180] sm:$0xff] }
  0xd0   : > { %823 = vrot.lane.b32.xlu1 %v3266_v24, %s2748_s6  ;;  %821 = vrot.lane.b32.xlu0 %v3269_v16, %s2748_s6 }
  0xd2   : > { %v3275_v36 = vpop.permute.xlu1 %647  ;;  %v3277_v37 = vpop.permute.xlu0 %645 }
  0xd3   : > { %4443 = vst [vmem:[#allocation44_spill] sm:$0xff] %v3275_v36  ;;  %4444 = vst [vmem:[#allocation45_spill] sm:$0xff] %v3277_v37 }
  0xd4   : > { %827 = vrot.lane.b32.xlu1 %v218_v23, %s2748_s6  ;;  %825 = vrot.lane.b32.xlu0 %v217_v52, %s2748_s6  ;;  %v1513_v52 = vsel %vm1505_vm0, %v3116_v44, %v3086_v27 }
  0xd6   : > { %v652_v16 = vpop.permute.xlu1 %651  ;;  %v650_v24 = vpop.permute.xlu0 %649 }
  0xd7   : > { %v3290_v36 = vsel %vm1538_vm1, %v1511_v39, %v652_v16  ;;  %v3293_v23 = vsel %vm1538_vm1, %v1510_v21, %v650_v24 }
  0xd8   : > { %831 = vrot.lane.b32.xlu1 %v2277_v38, %s2748_s6  ;;  %829 = vrot.lane.b32.xlu0 %v2276_v50, %s2748_s6  ;;  %v1515_v38 = vsel %vm1505_vm0, %v3128_v58, %v3097_v31  ;;  %v1514_v50 = vsel %vm1505_vm0, %v3131_v59, %v3099_v32 }
  0xda   : > { %v656_v26 = vpop.permute.xlu1 %655  ;;  %v654_v37 = vpop.permute.xlu0 %653 }
  0xdb   : > { %v3304_v39 = vsel %vm1538_vm1, %v1513_v52, %v656_v26  ;;  %v3307_v21 = vsel %vm1538_vm1, %v1512_v25, %v654_v37 }
  0xdc   : > { %899 = vrot.lane.b32.xlu1 %v2846_v2, %s2749_s7  ;;  %897 = vrot.lane.b32.xlu0 %v2839_v0, %s2749_s7  ;;  %v1517_v0 = vsel %vm1505_vm0, %v3146_v29, %v3111_v42  ;;  %v1516_v2 = vsel %vm1505_vm0, %v3149_v60, %v3113_v43 }
  0xde   : > { %v660_v27 = vpop.permute.xlu1 %659  ;;  %v658_v28 = vpop.permute.xlu0 %657 }
  0xdf   : > { %v3320_v16 = vsel %vm1538_vm1, %v1515_v38, %v660_v27  ;;  %v3323_v24 = vsel %vm1538_vm1, %v1514_v50, %v658_v28 }
  0xe0   : > { %903 = vrot.lane.b32.xlu1 %v2853_v4, %s2749_s7  ;;  %901 = vrot.lane.b32.xlu0 %v2856_v5, %s2749_s7 }
  0xe2   : > { %v664_v31 = vpop.permute.xlu1 %663  ;;  %v662_v32 = vpop.permute.xlu0 %661 }
  0xe3   : > { %v3336_v37 = vsel %vm1538_vm1, %v1517_v0, %v664_v31  ;;  %v3339_v52 = vsel %vm1538_vm1, %v1516_v2, %v662_v32 }
  0xe4   : > { %907 = vrot.lane.b32.xlu1 %v2863_v6, %s2749_s7  ;;  %905 = vrot.lane.b32.xlu0 %v2866_v7, %s2749_s7 }
  0xe6   : > { %v668_v25 = vpop.permute.xlu1 %667  ;;  %v666_v42 = vpop.permute.xlu0 %665 }
  0xe7   : > { %v3347_v26 = vsel %vm1538_vm1, %v3134_v62, %v668_v25  ;;  %v3351_v43 = vsel %vm1538_vm1, %v3137_v63, %v666_v42 }
  0xe8   : > { %911 = vrot.lane.b32.xlu1 %v2873_v8, %s2749_s7  ;;  %909 = vrot.lane.b32.xlu0 %v2876_v9, %s2749_s7 }
  0xea   : > { %v672_v38 = vpop.permute.xlu1 %671  ;;  %v670_v50 = vpop.permute.xlu0 %669 }
  0xeb   : > { %v3359_v27 = vsel %vm1538_vm1, %v3152_v48, %v672_v38  ;;  %v3363_v62 = vsel %vm1538_vm1, %v3155_v49, %v670_v50  ;;  %v1776_v50 = vld [vmem:[%s4359_s1 + $0x38] sm:$0xff] }
  0xec   : > { %915 = vrot.lane.b32.xlu1 %v2883_v10, %s2749_s7  ;;  %913 = vrot.lane.b32.xlu0 %v2886_v11, %s2749_s7  ;;  %v1527_v10 = vsel %vm1505_vm0, %v3206_v61, %v3173_v56  ;;  %v1526_v11 = vsel %vm1505_vm0, %v3209_v41, %v3175_v3 }
  0xee   : > { %v3369_v8 = vpop.permute.xlu1 %675  ;;  %v3371_v63 = vpop.permute.xlu0 %673 }
  0xf0   : > { %919 = vrot.lane.b32.xlu1 %v2893_v12, %s2749_s7  ;;  %917 = vrot.lane.b32.xlu0 %v2896_v13, %s2749_s7 }
  0xf2   : > { %v3377_v9 = vpop.permute.xlu1 %679  ;;  %v3379_v48 = vpop.permute.xlu0 %677 }
  0xf4   : > { %923 = vrot.lane.b32.xlu1 %v2903_v14, %s2749_s7  ;;  %921 = vrot.lane.b32.xlu0 %v2906_v15, %s2749_s7  ;;  %v1529_v14 = vsel %vm1505_vm0, %v3220_v57, %v3187_v46  ;;  %v1528_v15 = vsel %vm1505_vm0, %v3223_v54, %v3189_v47 }
  0xf6   : > { %v684_v12 = vpop.permute.xlu1 %683  ;;  %v682_v13 = vpop.permute.xlu0 %681 }
  0xf7   : > { %v3392_v49 = vsel %vm1538_vm1, %v1527_v10, %v684_v12  ;;  %v3395_v28 = vsel %vm1538_vm1, %v1526_v11, %v682_v13  ;;  %v4447_v10 = vld [vmem:[#allocation14_spill] sm:$0xff]  ;;  %v1775_v11 = vld [vmem:[%s4359_s1 + $0x30] sm:$0xff]  ;;  %v4448_v12 = vld [vmem:[#allocation36_spill] sm:$0xff] }
  0xf8   : > { %929 = vrot.lane.b32.xlu1 %v2923_v19, %s2749_s7  ;;  %925 = vrot.lane.b32.xlu0 %v2914_v17, %s2749_s7  ;;  %v1531_v17 = vsel %vm1505_vm0, %v3234_v55, %v3201_v30  ;;  %v1530_v19 = vsel %vm1505_vm0, %v3237_v22, %v3203_v1  ;;  %v4446_v1 = vld [vmem:[#allocation35_spill] sm:$0xff]  ;;  %v4449_v13 = vld [vmem:[#allocation42_spill] sm:$0xff] }
  0xf9   : > { %v1532_v25 = vsel %vm1505_vm0, %v3249_v20, %v4446_v1  ;;  %v4452_v1 = vld [vmem:[#allocation38_spill] sm:$0xff] }
  0xfa   : > { %v688_v56 = vpop.permute.xlu1 %687  ;;  %v686_v3 = vpop.permute.xlu0 %685 }
  0xfb   : > { %v3408_v0 = vsel %vm1538_vm1, %v1529_v14, %v688_v56  ;;  %v3411_v2 = vsel %vm1538_vm1, %v1528_v15, %v686_v3  ;;  %v1535_v14 = vsel %vm1505_vm0, %v4449_v13, %v4448_v12  ;;  %v4450_v15 = vld [vmem:[#allocation37_spill] sm:$0xff]  ;;  %v4451_v56 = vld [vmem:[#allocation43_spill] sm:$0xff]  ;;  %v1770_v12 = vld [vmem:[%s4359_s1 + $0x8] sm:$0xff] }
  0xfc   : > { %1025 = vrot.lane.b32.xlu1 %v2973_v35, %s2750_s8  ;;  %931 = vrot.lane.b32.xlu0 %v2920_v18, %s2749_s7  ;;  %v1777_v18 = vld [vmem:[%s4359_s1 + $0x40] sm:$0xff]  ;;  %v4445_v35 = vld [vmem:[#allocation34_spill] sm:$0xff]  ;;  %v1534_v3 = vsel %vm1505_vm0, %v4451_v56, %v4450_v15 }
  0xfd   : > { %2518 = vmatprep.subr.mxu0 %v1777_v18  ;;  %2584 = vmatprep.subr.mxu1 %v1777_v18  ;;  %v1533_v30 = vsel %vm1505_vm0, %v3246_v53, %v4445_v35  ;;  %v1769_v15 = vld [vmem:[%s4359_s1] sm:$0xff] }
  0xfe   : > { %v692_v46 = vpop.permute.xlu1 %691  ;;  %v690_v47 = vpop.permute.xlu0 %689  ;;  %2519 = vmatpush3.msra.mxu0 %v1777_v18  ;;  %2593 = vmatpush3.msra.mxu1 %v1777_v18 }
  0xff   : > { %v3424_v31 = vsel %vm1538_vm1, %v1531_v17, %v692_v46  ;;  %v3427_v32 = vsel %vm1538_vm1, %v1530_v19, %v690_v47  ;;  %2520 = vmatprep.subr.mxu0 %v1776_v50  ;;  %2585 = vmatprep.subr.mxu1 %v1776_v50  ;;  %v1774_v47 = vld [vmem:[%s4359_s1 + $0x28] sm:$0xff] }
 0x100   : > { %1027 = vrot.lane.b32.xlu1 %v2970_v34, %s2750_s8  ;;  %1057 = vrot.lane.b32.xlu0 %v3026_v51, %s2750_s8 }
 0x101   : > { %2521 = vmatpush3.msra.mxu0 %v1776_v50  ;;  %2594 = vmatpush3.msra.mxu1 %v1776_v50 }
 0x102   : > { %v696_v42 = vpop.permute.xlu1 %695  ;;  %v694_v38 = vpop.permute.xlu0 %693  ;;  %2522 = vmatprep.subr.mxu0 %v1775_v11  ;;  %2586 = vmatprep.subr.mxu1 %v1775_v11 }
 0x103   : > { %v3443_v34 = vsel %vm1538_vm1, %v1533_v30, %v696_v42  ;;  %v3446_v51 = vsel %vm1538_vm1, %v1532_v25, %v694_v38  ;;  %2523 = vmatpush3.msra.mxu0 %v1775_v11  ;;  %2595 = vmatpush3.msra.mxu1 %v1775_v11  ;;  %v1773_v30 = vld [vmem:[%s4359_s1 + $0x20] sm:$0xff]  ;;  %v4453_v42 = vld [vmem:[#allocation39_spill] sm:$0xff] }
 0x104   : > { %1153 = vrot.lane.b32.xlu1 %v3105_v40, %s2751_s19  ;;  %1059 = vrot.lane.b32.xlu0 %v4447_v10, %s2750_s8 }
 0x105   : > { %2524 = vmatprep.subr.mxu0 %v1774_v47  ;;  %2587 = vmatprep.subr.mxu1 %v1774_v47 }
 0x106   : > { %v700_v17 = vpop.permute.xlu1 %699  ;;  %v698_v19 = vpop.permute.xlu0 %697  ;;  %2525 = vmatpush3.msra.mxu0 %v1774_v47  ;;  %2596 = vmatpush3.msra.mxu1 %v1774_v47 }
 0x107   : > { %v3465_v40 = vsel %vm1538_vm1, %v1535_v14, %v700_v17  ;;  %v3468_v46 = vsel %vm1538_vm1, %v1534_v3, %v698_v19  ;;  %2526 = vmatprep.subr.mxu0 %v1773_v30  ;;  %2588 = vmatprep.subr.mxu1 %v1773_v30  ;;  %v4455_v14 = vld [vmem:[#allocation5_spill] sm:$0xff] }
 0x108   : > { %1155 = vrot.lane.b32.xlu1 %v3102_v33, %s2751_s19  ;;  %1185 = vrot.lane.b32.xlu0 %v3209_v41, %s2751_s19  ;;  %v1772_v41 = vld [vmem:[%s4359_s1 + $0x18] sm:$0xff] }
 0x109   : > { %2527 = vmatpush3.msra.mxu0 %v1773_v30  ;;  %2597 = vmatpush3.msra.mxu1 %v1773_v30 }
 0x10a   : > { %v704_v18 = vpop.permute.xlu1 %703  ;;  %v702_v35 = vpop.permute.xlu0 %701  ;;  %2528 = vmatprep.subr.mxu0 %v1772_v41  ;;  %2589 = vmatprep.subr.mxu1 %v1772_v41 }
 0x10b   : > { %v3482_v25 = vsel %vm1538_vm1, %v4452_v1, %v704_v18  ;;  %v3486_v33 = vsel %vm1538_vm1, %v4453_v42, %v702_v35  ;;  %2529 = vmatpush3.msra.mxu0 %v1772_v41  ;;  %2598 = vmatpush3.msra.mxu1 %v1772_v41  ;;  %v4457_v18 = vld [vmem:[#allocation10_spill] sm:$0xff] }
 0x10c   : > { %1281 = vrot.lane.b32.xlu1 %v2856_v5, %s2752_s5  ;;  %1187 = vrot.lane.b32.xlu0 %v3206_v61, %s2751_s19  ;;  %v1771_v5 = vld [vmem:[%s4359_s1 + $0x10] sm:$0xff]  ;;  %v4454_v61 = vld [vmem:[#allocation6_spill] sm:$0xff] }
 0x10d   : > { %2530 = vmatprep.subr.mxu0 %v1771_v5  ;;  %2590 = vmatprep.subr.mxu1 %v1771_v5 }
 0x10e   : > { %v3495_v38 = vpop.permute.xlu1 %771  ;;  %v3497_v50 = vpop.permute.xlu0 %769  ;;  %2531 = vmatpush3.msra.mxu0 %v1771_v5  ;;  %2599 = vmatpush3.msra.mxu1 %v1771_v5  ;;  %v4458_v5 = vld [vmem:[#allocation9_spill] sm:$0xff] }
 0x10f   : > { %2532 = vmatprep.subr.mxu0 %v1770_v12  ;;  %2591 = vmatprep.subr.mxu1 %v1770_v12 }
 0x110   : > { %933 = vrot.lane.b32.xlu1 %v4454_v61, %s2749_s7  ;;  %1313 = vrot.lane.b32.xlu0 %v4454_v61, %s2752_s5 }
 0x111   : > { %2533 = vmatpush3.msra.mxu0 %v1770_v12  ;;  %2600 = vmatpush3.msra.mxu1 %v1770_v12 }
 0x112   : > { %v3506_v10 = vpop.permute.xlu1 %775  ;;  %v3508_v11 = vpop.permute.xlu0 %773  ;;  %2534 = vmatprep.subr.mxu0 %v1769_v15  ;;  %2592 = vmatprep.subr.mxu1 %v1769_v15 }
 0x113   : > { %2535 = vmatpush3.msra.mxu0 %v1769_v15  ;;  %2601 = vmatpush3.msra.mxu1 %v1769_v15 }
 0x114   : > { %1315 = vrot.lane.b32.xlu1 %v4455_v14, %s2752_s5  ;;  %1283 = vrot.lane.b32.xlu0 %v2853_v4, %s2752_s5  ;;  %v4456_v4 = vld [vmem:[#allocation16_spill] sm:$0xff] }
 0x116   : > { %v780_v3 = vpop.permute.xlu1 %779  ;;  %v778_v17 = vpop.permute.xlu0 %777 }
 0x117   : > { %v3522_v19 = vsel %vm1571_vm2, %v3290_v36, %v780_v3  ;;  %v3526_v47 = vsel %vm1571_vm2, %v3293_v23, %v778_v17 }
 0x118   : > { %1441 = vrot.lane.b32.xlu1 %v4456_v4, %s2753_s27  ;;  %1409 = vrot.lane.b32.xlu0 %v4457_v18, %s2753_s27 }
 0x11a   : > { %v784_v35 = vpop.permute.xlu1 %783  ;;  %v782_v30 = vpop.permute.xlu0 %781 }
 0x11b   : > { %v3534_v36 = vsel %vm1571_vm2, %v3304_v39, %v784_v35  ;;  %v3538_v23 = vsel %vm1571_vm2, %v3307_v21, %v782_v30 }
 0x11c   : > { %1029 = vrot.lane.b32.xlu1 %v4457_v18, %s2750_s8  ;;  %935 = vrot.lane.b32.xlu0 %v4455_v14, %s2749_s7  ;;  %v4465_v18 = vld [vmem:[#allocation8_spill] sm:$0xff] }
 0x11e   : > { %v788_v1 = vpop.permute.xlu1 %787  ;;  %v786_v42 = vpop.permute.xlu0 %785 }
 0x11f   : > { %v3546_v41 = vsel %vm1571_vm2, %v3320_v16, %v788_v1  ;;  %v3550_v39 = vsel %vm1571_vm2, %v3323_v24, %v786_v42  ;;  %v4460_v24 = vld [vmem:[#allocation15_spill] sm:$0xff] }
 0x120   : > { %1411 = vrot.lane.b32.xlu1 %v4458_v5, %s2753_s27  ;;  %1061 = vrot.lane.b32.xlu0 %v4456_v4, %s2750_s8 }
 0x122   : > { %v792_v21 = vpop.permute.xlu1 %791  ;;  %v790_v61 = vpop.permute.xlu0 %789 }
 0x123   : > { %v3558_v12 = vsel %vm1571_vm2, %v3336_v37, %v792_v21  ;;  %v3562_v16 = vsel %vm1571_vm2, %v3339_v52, %v790_v61 }
 0x124   : > { %4459 = vst [vmem:[#allocation34_spill] sm:$0xff] %v3558_v12  ;;  %1031 = vrot.lane.b32.xlu1 %v4458_v5, %s2750_s8  ;;  %1443 = vrot.lane.b32.xlu0 %v4460_v24, %s2753_s27  ;;  %v4467_v5 = vld [vmem:[#allocation18_spill] sm:$0xff]  ;;  %v4487_v12 = vld [vmem:[#allocation41_spill] sm:$0xff] }
 0x126   : > { %v796_v14 = vpop.permute.xlu1 %795  ;;  %v794_v15 = vpop.permute.xlu0 %793 }
 0x127   : > { %v3570_v3 = vsel %vm1571_vm2, %v3347_v26, %v796_v14  ;;  %v3574_v37 = vsel %vm1571_vm2, %v3351_v43, %v794_v15  ;;  %v4471_v15 = vld [vmem:[#allocation11_spill] sm:$0xff] }
 0x128   : > { %4461 = vst [vmem:[#allocation35_spill] sm:$0xff] %v3570_v3  ;;  %4462 = vst [vmem:[#allocation14_spill] sm:$0xff] %v3574_v37  ;;  %1157 = vrot.lane.b32.xlu1 %v3119_v45, %s2751_s19  ;;  %1063 = vrot.lane.b32.xlu0 %v4460_v24, %s2750_s8 }
 0x12a   : > { %v800_v52 = vpop.permute.xlu1 %799  ;;  %v798_v17 = vpop.permute.xlu0 %797 }
 0x12b   : > { %v3582_v4 = vsel %vm1571_vm2, %v3359_v27, %v800_v52  ;;  %v3586_v26 = vsel %vm1571_vm2, %v3363_v62, %v798_v17 }
 0x12c   : > { %4463 = vst [vmem:[#allocation36_spill] sm:$0xff] %v3582_v4  ;;  %4464 = vst [vmem:[#allocation42_spill] sm:$0xff] %v3586_v26  ;;  %1159 = vrot.lane.b32.xlu1 %v3116_v44, %s2751_s19  ;;  %1189 = vrot.lane.b32.xlu0 %v3223_v54, %s2751_s19 }
 0x12e   : > { %v3592_v45 = vpop.permute.xlu1 %803  ;;  %v3594_v43 = vpop.permute.xlu0 %801 }
 0x130   : > { %1285 = vrot.lane.b32.xlu1 %v2866_v7, %s2752_s5  ;;  %1191 = vrot.lane.b32.xlu0 %v3220_v57, %s2751_s19  ;;  %v4466_v57 = vld [vmem:[#allocation7_spill] sm:$0xff] }
 0x132   : > { %v3600_v27 = vpop.permute.xlu1 %807  ;;  %v3602_v62 = vpop.permute.xlu0 %805 }
 0x134   : > { %937 = vrot.lane.b32.xlu1 %v4465_v18, %s2749_s7  ;;  %1317 = vrot.lane.b32.xlu0 %v4465_v18, %s2752_s5 }
 0x136   : > { %v812_v54 = vpop.permute.xlu1 %811  ;;  %v810_v44 = vpop.permute.xlu0 %809 }
 0x137   : > { %v3610_v35 = vsel %vm1571_vm2, %v3392_v49, %v812_v54  ;;  %v3614_v7 = vsel %vm1571_vm2, %v3395_v28, %v810_v44  ;;  %v4468_v28 = vld [vmem:[#allocation12_spill] sm:$0xff] }
 0x138   : > { %1319 = vrot.lane.b32.xlu1 %v4466_v57, %s2752_s5  ;;  %1287 = vrot.lane.b32.xlu0 %v2863_v6, %s2752_s5 }
 0x13a   : > { %v816_v30 = vpop.permute.xlu1 %815  ;;  %v814_v1 = vpop.permute.xlu0 %813 }
 0x13b   : > { %v3622_v42 = vsel %vm1571_vm2, %v3408_v0, %v816_v30  ;;  %v3626_v49 = vsel %vm1571_vm2, %v3411_v2, %v814_v1 }
 0x13c   : > { %1445 = vrot.lane.b32.xlu1 %v4467_v5, %s2753_s27  ;;  %1413 = vrot.lane.b32.xlu0 %v4468_v28, %s2753_s27 }
 0x13e   : > { %v820_v21 = vpop.permute.xlu1 %819  ;;  %v818_v61 = vpop.permute.xlu0 %817 }
 0x13f   : > { %v3634_v6 = vsel %vm1571_vm2, %v3424_v31, %v820_v21  ;;  %v3638_v0 = vsel %vm1571_vm2, %v3427_v32, %v818_v61 }
 0x140   : > { %1033 = vrot.lane.b32.xlu1 %v4468_v28, %s2750_s8  ;;  %939 = vrot.lane.b32.xlu0 %v4466_v57, %s2749_s7 }
 0x142   : > { %v824_v2 = vpop.permute.xlu1 %823  ;;  %v822_v24 = vpop.permute.xlu0 %821 }
 0x143   : > { %v3646_v14 = vsel %vm1571_vm2, %v3443_v34, %v824_v2  ;;  %v3650_v31 = vsel %vm1571_vm2, %v3446_v51, %v822_v24  ;;  %v4474_v51 = vld [vmem:[#allocation17_spill] sm:$0xff]  ;;  %v4477_v2 = vld [vmem:[#allocation20_spill] sm:$0xff] }
 0x144   : > { %4469 = vst [vmem:[#allocation37_spill] sm:$0xff] %v3646_v14  ;;  %4470 = vst [vmem:[#allocation43_spill] sm:$0xff] %v3650_v31  ;;  %1415 = vrot.lane.b32.xlu1 %v4471_v15, %s2753_s27  ;;  %1065 = vrot.lane.b32.xlu0 %v4467_v5, %s2750_s8  ;;  %v4478_v24 = vld [vmem:[#allocation13_spill] sm:$0xff] }
 0x146   : > { %v828_v32 = vpop.permute.xlu1 %827  ;;  %v826_v52 = vpop.permute.xlu0 %825 }
 0x147   : > { %v3658_v17 = vsel %vm1571_vm2, %v3465_v40, %v828_v32  ;;  %v3662_v34 = vsel %vm1571_vm2, %v3468_v46, %v826_v52  ;;  %v2411_v52 = vld [vmem:[%s2836_s30 + $0x6a] sm:$0xff] }
 0x148   : > { %4472 = vst [vmem:[#allocation38_spill] sm:$0xff] %v3658_v17  ;;  %4473 = vst [vmem:[#allocation39_spill] sm:$0xff] %v3662_v34  ;;  %1035 = vrot.lane.b32.xlu1 %v4471_v15, %s2750_s8  ;;  %1447 = vrot.lane.b32.xlu0 %v4474_v51, %s2753_s27  ;;  %v2428_v17 = vld [vmem:[%s2836_s30 + $0x13a] sm:$0xff]  ;;  %v4484_v34 = vld [vmem:[#allocation22_spill] sm:$0xff] }
 0x14a   : > { %v832_v18 = vpop.permute.xlu1 %831  ;;  %v830_v54 = vpop.permute.xlu0 %829 }
 0x14b   : > { %v3670_v44 = vsel %vm1571_vm2, %v3482_v25, %v832_v18  ;;  %v3674_v40 = vsel %vm1571_vm2, %v3486_v33, %v830_v54  ;;  %v2378_v25 = vld [vmem:[%s2836_s30 + $0x61] sm:$0xff] }
 0x14c   : > { %4475 = vst [vmem:[#allocation6_spill] sm:$0xff] %v3670_v44  ;;  %4476 = vst [vmem:[#allocation5_spill] sm:$0xff] %v3674_v40  ;;  %1161 = vrot.lane.b32.xlu1 %v3131_v59, %s2751_s19  ;;  %1067 = vrot.lane.b32.xlu0 %v4474_v51, %s2750_s8  ;;  %v2300_v59 = vld [vmem:[%s2836_s30 + $0x121] sm:$0xff] }
 0x14e   : > { %v3680_v46 = vpop.permute.xlu1 %899  ;;  %v3682_v57 = vpop.permute.xlu0 %897 }
 0x150   : > { %1163 = vrot.lane.b32.xlu1 %v3128_v58, %s2751_s19  ;;  %1193 = vrot.lane.b32.xlu0 %v3237_v22, %s2751_s19  ;;  %v2395_v22 = vld [vmem:[%s2836_s30 + $0x129] sm:$0xff] }
 0x151   : > { %v2379_v58 = vld [vmem:[%s2836_s30 + $0x69] sm:$0xff] }
 0x152   : > { %v3689_v33 = vpop.permute.xlu1 %903  ;;  %v3691_v30 = vpop.permute.xlu0 %901 }
 0x154   : > { %1289 = vrot.lane.b32.xlu1 %v2378_v25, %s2752_s5  ;;  %1195 = vrot.lane.b32.xlu0 %v3234_v55, %s2751_s19 }
 0x156   : > { %v3697_v1 = vpop.permute.xlu1 %907  ;;  %v3699_v5 = vpop.permute.xlu0 %905 }
 0x158   : > { %941 = vrot.lane.b32.xlu1 %v2300_v59, %s2749_s7  ;;  %1321 = vrot.lane.b32.xlu0 %v2300_v59, %s2752_s5  ;;  %v4483_v59 = vld [vmem:[#allocation19_spill] sm:$0xff] }
 0x15a   : > { %v3705_v28 = vpop.permute.xlu1 %911  ;;  %v3707_v21 = vpop.permute.xlu0 %909 }
 0x15c   : > { %1323 = vrot.lane.b32.xlu1 %v2395_v22, %s2752_s5  ;;  %1291 = vrot.lane.b32.xlu0 %v2379_v58, %s2752_s5 }
 0x15e   : > { %v3711_v55 = vpop.permute.xlu1 %915  ;;  %v3713_v61 = vpop.permute.xlu0 %913 }
 0x160   : > { %1449 = vrot.lane.b32.xlu1 %v4477_v2, %s2753_s27  ;;  %1417 = vrot.lane.b32.xlu0 %v4478_v24, %s2753_s27 }
 0x162   : > { %v3719_v15 = vpop.permute.xlu1 %919  ;;  %v3721_v32 = vpop.permute.xlu0 %917 }
 0x163   : > { %4479 = vst [vmem:[#allocation16_spill] sm:$0xff] %v3719_v15 }
 0x164   : > { %1037 = vrot.lane.b32.xlu1 %v4478_v24, %s2750_s8  ;;  %943 = vrot.lane.b32.xlu0 %v2395_v22, %s2749_s7 }
 0x166   : > { %v3727_v51 = vpop.permute.xlu1 %923  ;;  %v3729_v18 = vpop.permute.xlu0 %921 }
 0x167   : > { %4480 = vst [vmem:[#allocation10_spill] sm:$0xff] %v3727_v51  ;;  %4481 = vst [vmem:[#allocation9_spill] sm:$0xff] %v3729_v18  ;;  %v4485_v18 = vld [vmem:[#allocation27_spill] sm:$0xff] }
 0x168   : > { %1419 = vrot.lane.b32.xlu1 %v2411_v52, %s2753_s27  ;;  %1069 = vrot.lane.b32.xlu0 %v4477_v2, %s2750_s8 }
 0x16a   : > { %v930_v54 = vpop.permute.xlu1 %929  ;;  %v3734_v25 = vpop.permute.xlu0 %925 }
 0x16b   : > { %4482 = vst [vmem:[#allocation15_spill] sm:$0xff] %v3734_v25 }
 0x16c   : > { %1039 = vrot.lane.b32.xlu1 %v2411_v52, %s2750_s8  ;;  %1451 = vrot.lane.b32.xlu0 %v4483_v59, %s2753_s27  ;;  %v2380_v52 = vld [vmem:[%s2836_s30 + $0x79] sm:$0xff] }
 0x16e   : > { %v1026_v22 = vpop.permute.xlu1 %1025  ;;  %v3739_v58 = vpop.permute.xlu0 %931 }
 0x170   : > { %1165 = vrot.lane.b32.xlu1 %v3149_v60, %s2751_s19  ;;  %1071 = vrot.lane.b32.xlu0 %v4483_v59, %s2750_s8  ;;  %v2302_v60 = vld [vmem:[%s2836_s30 + $0x139] sm:$0xff] }
 0x172   : > { %v3745_v2 = vpop.permute.xlu1 %1027  ;;  %v1058_v24 = vpop.permute.xlu0 %1057 }
 0x174   : > { %1167 = vrot.lane.b32.xlu1 %v3146_v29, %s2751_s19  ;;  %1197 = vrot.lane.b32.xlu0 %v3249_v20, %s2751_s19  ;;  %v2397_v20 = vld [vmem:[%s2836_s30 + $0x141] sm:$0xff] }
 0x175   : > { %v2381_v29 = vld [vmem:[%s2836_s30 + $0x81] sm:$0xff] }
 0x176   : > { %v1154_v4 = vpop.permute.xlu1 %1153  ;;  %v3752_v44 = vpop.permute.xlu0 %1059 }
 0x178   : > { %1293 = vrot.lane.b32.xlu1 %v2380_v52, %s2752_s5  ;;  %1199 = vrot.lane.b32.xlu0 %v3246_v53, %s2751_s19  ;;  %v187_v52 = vld [vmem:[%s2836_s30] sm:$0xff] }
 0x179   : > { %v2412_v53 = vld [vmem:[%s2836_s30 + $0x7a] sm:$0xff]  ;;  %v1506_v37 = vsel %vm1505_vm0, %v187_v52, %v4484_v34 }
 0x17a   : > { %v3758_v59 = vpop.permute.xlu1 %1155  ;;  %v1186_v40 = vpop.permute.xlu0 %1185 }
 0x17c   : > { %945 = vrot.lane.b32.xlu1 %v2302_v60, %s2749_s7  ;;  %1325 = vrot.lane.b32.xlu0 %v2302_v60, %s2752_s5  ;;  %v4486_v60 = vld [vmem:[#allocation31_spill] sm:$0xff] }
 0x17d   : > { %v1522_v14 = vsel %vm1505_vm0, %v4486_v60, %v4485_v18 }
 0x17e   : > { %v1282_v26 = vpop.permute.xlu1 %1281  ;;  %v3764_v25 = vpop.permute.xlu0 %1187  ;;  %v1555_v15 = vsel %vm1538_vm1, %v1522_v14, %v3371_v63 }
 0x17f   : > { %v1588_v18 = vsel %vm1571_vm2, %v1555_v15, %v3594_v43  ;;  %v2413_v15 = vld [vmem:[%s2836_s30 + $0x82] sm:$0xff] }
 0x180   : > { %1327 = vrot.lane.b32.xlu1 %v2397_v20, %s2752_s5  ;;  %1295 = vrot.lane.b32.xlu0 %v2381_v29, %s2752_s5  ;;  %v1539_v29 = vsel %vm1538_vm1, %v1506_v37, %v4487_v12  ;;  %v1621_v12 = vsel %vm1604_vm3, %v1588_v18, %v930_v54 }
 0x181   : > { %v1572_v34 = vsel %vm1571_vm2, %v1539_v29, %v3497_v50  ;;  %v1654_v63 = vsel %vm1637_vm4, %v1621_v12, %v1058_v24  ;;  %v188_v50 = vld [vmem:[%s2836_s30 + $0x8] sm:$0xff] }
 0x182   : > { %v3771_v3 = vpop.permute.xlu1 %933  ;;  %v1314_v51 = vpop.permute.xlu0 %1313  ;;  %v1605_v31 = vsel %vm1604_vm3, %v1572_v34, %v3682_v57  ;;  %v1687_v14 = vsel %vm1670_vm5, %v1654_v63, %v1186_v40  ;;  %v2429_v40 = vld [vmem:[%s2836_s30 + $0x142] sm:$0xff] }
 0x183   : > { %v1638_v37 = vsel %vm1637_vm4, %v1605_v31, %v1026_v22  ;;  %v1720_v54 = vsel %vm1703_vm6, %v1687_v14, %v1314_v51  ;;  %v4491_v63 = vld [vmem:[#allocation30_spill] sm:$0xff]  ;;  %v2350_v14 = vld [vmem:[%s2836_s30 + $0x90] sm:$0xff] }
 0x184   : > { %1453 = vrot.lane.b32.xlu1 %v2428_v17, %s2753_s27  ;;  %1421 = vrot.lane.b32.xlu0 %v2412_v53, %s2753_s27  ;;  %v1671_v43 = vsel %vm1670_vm5, %v1638_v37, %v1154_v4  ;;  %v4489_v4 = vld [vmem:[#allocation40_spill] sm:$0xff]  ;;  %v4490_v37 = vld [vmem:[#allocation26_spill] sm:$0xff] }
 0x185   : > { %v1704_v57 = vsel %vm1703_vm6, %v1671_v43, %v1282_v26 }
 0x186   : > { %v1316_v52 = vpop.permute.xlu1 %1315  ;;  %v1284_v60 = vpop.permute.xlu0 %1283 }
 0x188   : > { %1041 = vrot.lane.b32.xlu1 %v2412_v53, %s2750_s8  ;;  %947 = vrot.lane.b32.xlu0 %v2397_v20, %s2749_s7  ;;  %v4488_v20 = vld [vmem:[#allocation24_spill] sm:$0xff] }
 0x189   : > { %v1507_v53 = vsel %vm1505_vm0, %v188_v50, %v4488_v20 }
 0x18a   : > { %v1442_v29 = vpop.permute.xlu1 %1441  ;;  %v1410_v31 = vpop.permute.xlu0 %1409  ;;  %v1540_v26 = vsel %vm1538_vm1, %v1507_v53, %v4489_v4  ;;  %v2383_v4 = vld [vmem:[%s2836_s30 + $0x99] sm:$0xff] }
 0x18b   : > { %v1737_v22 = vsel %vm1736_vm7, %v1704_v57, %v1410_v31  ;;  %v1753_v24 = vsel %vm1736_vm7, %v1720_v54, %v1442_v29  ;;  %v1573_v51 = vsel %vm1571_vm2, %v1540_v26, %v3495_v38 }
 0x18c   : > { %1423 = vrot.lane.b32.xlu1 %v2413_v15, %s2753_s27  ;;  %1073 = vrot.lane.b32.xlu0 %v2428_v17, %s2750_s8  ;;  %v1606_v12 = vsel %vm1604_vm3, %v1573_v51, %v3680_v46  ;;  %v1523_v17 = vsel %vm1505_vm0, %v4491_v63, %v4490_v37  ;;  %v2430_v51 = vld [vmem:[%s2836_s30 + $0x152] sm:$0xff]  ;;  %v4492_v63 = vld [vmem:[#allocation21_spill] sm:$0xff] }
 0x18d   : > { %2536 = vmatprep.mubr.msk.f32.mxu0 %vm1785_vm8, %v1737_v22  ;;  %2560 = vmatprep.mubr.msk.f32.mxu1 %vm1785_vm8, %v1753_v24  ;;  %v1639_v50 = vsel %vm1637_vm4, %v1606_v12, %v3745_v2  ;;  %v1556_v38 = vsel %vm1538_vm1, %v1523_v17, %v3369_v8  ;;  %v2414_v12 = vld [vmem:[%s2836_s30 + $0x92] sm:$0xff]  ;;  %v4493_v17 = vld [vmem:[#allocation25_spill] sm:$0xff] }
 0x18e   : > { %v1030_v34 = vpop.permute.xlu1 %1029  ;;  %v3814_v18 = vpop.permute.xlu0 %935  ;;  %v1672_v43 = vsel %vm1670_vm5, %v1639_v50, %v3758_v59  ;;  %v1589_v46 = vsel %vm1571_vm2, %v1556_v38, %v3592_v45  ;;  %v2351_v59 = vld [vmem:[%s2836_s30 + $0x98] sm:$0xff]  ;;  %v1508_v50 = vsel %vm1505_vm0, %v4493_v17, %v4492_v63  ;;  %v4494_v38 = vld [vmem:[#allocation29_spill] sm:$0xff] }
 0x18f   : > { %v1705_v57 = vsel %vm1703_vm6, %v1672_v43, %v1284_v60  ;;  %v1622_v2 = vsel %vm1604_vm3, %v1589_v46, %v3739_v58  ;;  %v4495_v43 = vld [vmem:[#allocation33_spill] sm:$0xff] }
 0x190   : > { %1043 = vrot.lane.b32.xlu1 %v2413_v15, %s2750_s8  ;;  %1455 = vrot.lane.b32.xlu0 %v2429_v40, %s2753_s27  ;;  %v1655_v8 = vsel %vm1637_vm4, %v1622_v2, %v3752_v44  ;;  %v4496_v46 = vld [vmem:[#allocation45_spill] sm:$0xff] }
 0x191   : > { %v1688_v45 = vsel %vm1670_vm5, %v1655_v8, %v3764_v25  ;;  %v2382_v25 = vld [vmem:[%s2836_s30 + $0x91] sm:$0xff] }
 0x192   : > { %v1412_v54 = vpop.permute.xlu1 %1411  ;;  %v1062_v29 = vpop.permute.xlu0 %1061  ;;  %v1721_v60 = vsel %vm1703_vm6, %v1688_v45, %v1316_v52  ;;  %v2304_v52 = vld [vmem:[%s2836_s30 + $0x151] sm:$0xff] }
 0x193   : > { %v1738_v15 = vsel %vm1736_vm7, %v1705_v57, %v1412_v54  ;;  %v1541_v57 = vsel %vm1538_vm1, %v1508_v50, %v4496_v46 }
 0x194   : > { %1169 = vrot.lane.b32.xlu1 %v2350_v14, %s2751_s19  ;;  %1075 = vrot.lane.b32.xlu0 %v2429_v40, %s2750_s8  ;;  %v1524_v14 = vsel %vm1505_vm0, %v4495_v43, %v4494_v38  ;;  %v1574_v2 = vsel %vm1571_vm2, %v1541_v57, %v3508_v11  ;;  %v4499_v38 = vld [vmem:[#allocation28_spill] sm:$0xff]  ;;  %v2352_v57 = vld [vmem:[%s2836_s30 + $0xa8] sm:$0xff] }
 0x195   : > { %2537 = vmatmul.mubr.msk.f32.vlgmr.msra.gmra.mxu0 %vm1785_vm8, %v1738_v15  ;;  %v1557_v54 = vsel %vm1538_vm1, %v1524_v14, %v3379_v48  ;;  %v4500_v43 = vld [vmem:[#allocation32_spill] sm:$0xff] }
 0x196   : > { %v3845_v31 = vpop.permute.xlu1 %1031  ;;  %v1444_v58 = vpop.permute.xlu0 %1443  ;;  %v1590_v15 = vsel %vm1571_vm2, %v1557_v54, %v3602_v62  ;;  %v2415_v62 = vld [vmem:[%s2836_s30 + $0x9a] sm:$0xff] }
 0x197   : > { %v1754_v44 = vsel %vm1736_vm7, %v1721_v60, %v1444_v58  ;;  %v1623_v60 = vsel %vm1604_vm3, %v1590_v15, %v3771_v3 }
 0x198   : > { %1171 = vrot.lane.b32.xlu1 %v2351_v59, %s2751_s19  ;;  %1201 = vrot.lane.b32.xlu0 %v4451_v56, %s2751_s19  ;;  %v2399_v56 = vld [vmem:[%s2836_s30 + $0x159] sm:$0xff]  ;;  %v1607_v59 = vsel %vm1604_vm3, %v1574_v2, %v3691_v30 }
 0x199   : > { %2561 = vmatmul.mubr.msk.f32.vlgmr.msra.gmra.mxu1 %vm1785_vm8, %v1754_v44  ;;  %v1640_v58 = vsel %vm1637_vm4, %v1607_v59, %v1030_v34  ;;  %v1656_v44 = vsel %vm1637_vm4, %v1623_v60, %v1062_v29 }
 0x19a   : > { %v1158_v22 = vpop.permute.xlu1 %1157  ;;  %v3853_v24 = vpop.permute.xlu0 %1063 }
 0x19b   : > { %v1673_v48 = vsel %vm1670_vm5, %v1640_v58, %v1158_v22  ;;  %v4498_v22 = vld [vmem:[#allocation44_spill] sm:$0xff] }
 0x19c   : > { %1297 = vrot.lane.b32.xlu1 %v2382_v25, %s2752_s5  ;;  %1203 = vrot.lane.b32.xlu0 %v4449_v13, %s2751_s19 }
 0x19e   : > { %v1160_v20 = vpop.permute.xlu1 %1159  ;;  %v1190_v53 = vpop.permute.xlu0 %1189 }
 0x19f   : > { %v1689_v11 = vsel %vm1670_vm5, %v1656_v44, %v1190_v53 }
 0x1a0   : > { %949 = vrot.lane.b32.xlu1 %v2304_v52, %s2749_s7  ;;  %1329 = vrot.lane.b32.xlu0 %v2304_v52, %s2752_s5 }
 0x1a2   : > { %v1286_v26 = vpop.permute.xlu1 %1285  ;;  %v1192_v40 = vpop.permute.xlu0 %1191 }
 0x1a3   : > { %v1706_v25 = vsel %vm1703_vm6, %v1673_v48, %v1286_v26  ;;  %v2431_v26 = vld [vmem:[%s2836_s30 + $0x15a] sm:$0xff] }
 0x1a4   : > { %1331 = vrot.lane.b32.xlu1 %v2399_v56, %s2752_s5  ;;  %1299 = vrot.lane.b32.xlu0 %v2383_v4, %s2752_s5  ;;  %v2667_v4 = vld [vmem:[%s2836_s30 + $0x20] sm:$0xff] }
 0x1a6   : > { %v3867_v37 = vpop.permute.xlu1 %937  ;;  %v1318_v13 = vpop.permute.xlu0 %1317 }
 0x1a7   : > { %v1722_v30 = vsel %vm1703_vm6, %v1689_v11, %v1318_v13 }
 0x1a8   : > { %1457 = vrot.lane.b32.xlu1 %v2430_v51, %s2753_s27  ;;  %1425 = vrot.lane.b32.xlu0 %v2414_v12, %s2753_s27 }
 0x1aa   : > { %v1320_v8 = vpop.permute.xlu1 %1319  ;;  %v1288_v45 = vpop.permute.xlu0 %1287 }
 0x1ac   : > { %1045 = vrot.lane.b32.xlu1 %v2414_v12, %s2750_s8  ;;  %951 = vrot.lane.b32.xlu0 %v2399_v56, %s2749_s7  ;;  %v4497_v12 = vld [vmem:[#allocation23_spill] sm:$0xff] }
 0x1ad   : > { %v1509_v56 = vsel %vm1505_vm0, %v2667_v4, %v4497_v12  ;;  %v2416_v4 = vld [vmem:[%s2836_s30 + $0xaa] sm:$0xff] }
 0x1ae   : > { %v1446_v52 = vpop.permute.xlu1 %1445  ;;  %v1414_v3 = vpop.permute.xlu0 %1413  ;;  %v1542_v53 = vsel %vm1538_vm1, %v1509_v56, %v4498_v22 }
 0x1af   : > { %v1755_v34 = vsel %vm1736_vm7, %v1722_v30, %v1446_v52  ;;  %v1739_v29 = vsel %vm1736_vm7, %v1706_v25, %v1414_v3  ;;  %v1575_v13 = vsel %vm1571_vm2, %v1542_v53, %v3506_v10  ;;  %v2401_v30 = vld [vmem:[%s2836_s30 + $0x171] sm:$0xff] }
 0x1b0   : > { %1427 = vrot.lane.b32.xlu1 %v2415_v62, %s2753_s27  ;;  %1077 = vrot.lane.b32.xlu0 %v2430_v51, %s2750_s8  ;;  %v1608_v50 = vsel %vm1604_vm3, %v1575_v13, %v3689_v33  ;;  %v1525_v51 = vsel %vm1505_vm0, %v4500_v43, %v4499_v38  ;;  %v2385_v52 = vld [vmem:[%s2836_s30 + $0xb1] sm:$0xff]  ;;  %v1625_v13 = vsel %vm1604_vm3, %v3614_v7, %v3867_v37 }
 0x1b1   : > { %2539 = vmatprep.mubr.msk.f32.mxu0 %vm1785_vm8, %v1739_v29  ;;  %2563 = vmatprep.mubr.msk.f32.mxu1 %vm1785_vm8, %v1755_v34  ;;  %v1641_v14 = vsel %vm1637_vm4, %v1608_v50, %v3845_v31  ;;  %v1558_v10 = vsel %vm1538_vm1, %v1525_v51, %v3377_v9  ;;  %v2432_v29 = vld [vmem:[%s2836_s30 + $0x16a] sm:$0xff] }
 0x1b2   : > { %v1034_v63 = vpop.permute.xlu1 %1033  ;;  %v3912_v17 = vpop.permute.xlu0 %939  ;;  %v1674_v46 = vsel %vm1670_vm5, %v1641_v14, %v1160_v20  ;;  %v1591_v33 = vsel %vm1571_vm2, %v1558_v10, %v3600_v27  ;;  %v2353_v20 = vld [vmem:[%s2836_s30 + $0xb0] sm:$0xff] }
 0x1b3   : > { %v1707_v54 = vsel %vm1703_vm6, %v1674_v46, %v1288_v45  ;;  %v1624_v31 = vsel %vm1604_vm3, %v1591_v33, %v3814_v18  ;;  %v2368_v45 = vld [vmem:[%s2836_s30 + $0x168] sm:$0xff]  ;;  %v2417_v14 = vld [vmem:[%s2836_s30 + $0xb2] sm:$0xff] }
 0x1b4   : > { %1047 = vrot.lane.b32.xlu1 %v2415_v62, %s2750_s8  ;;  %1459 = vrot.lane.b32.xlu0 %v2431_v26, %s2753_s27  ;;  %v1657_v9 = vsel %vm1637_vm4, %v1624_v31, %v3853_v24  ;;  %v2384_v24 = vld [vmem:[%s2836_s30 + $0xa9] sm:$0xff]  ;;  %v2433_v46 = vld [vmem:[%s2836_s30 + $0x172] sm:$0xff] }
 0x1b5   : > { %v1690_v27 = vsel %vm1670_vm5, %v1657_v9, %v1192_v40  ;;  %v2369_v40 = vld [vmem:[%s2836_s30 + $0x170] sm:$0xff]  ;;  %v2354_v31 = vld [vmem:[%s2836_s30 + $0xc0] sm:$0xff] }
 0x1b6   : > { %v1416_v2 = vpop.permute.xlu1 %1415  ;;  %v1066_v15 = vpop.permute.xlu0 %1065  ;;  %v1723_v18 = vsel %vm1703_vm6, %v1690_v27, %v1320_v8  ;;  %v2306_v8 = vld [vmem:[%s2836_s30 + $0x169] sm:$0xff] }
 0x1b7   : > { %v1740_v59 = vsel %vm1736_vm7, %v1707_v54, %v1416_v2  ;;  %v1658_v38 = vsel %vm1637_vm4, %v1625_v13, %v1066_v15  ;;  %v1610_v54 = vsel %vm1604_vm3, %v3522_v19, %v3697_v1  ;;  %v1611_v13 = vsel %vm1604_vm3, %v3538_v23, %v3707_v21 }
 0x1b8   : > { %1173 = vrot.lane.b32.xlu1 %v2352_v57, %s2751_s19  ;;  %1079 = vrot.lane.b32.xlu0 %v2431_v26, %s2750_s8  ;;  %v1609_v26 = vsel %vm1604_vm3, %v3526_v47, %v3699_v5 }
 0x1b9   : > { %2540 = vmatmul.mubr.msk.f32.gmra.mxu0 %vm1785_vm8, %v1740_v59  ;;  %v1642_v50 = vsel %vm1637_vm4, %v1609_v26, %v1034_v63 }
 0x1ba   : > { %v1036_v60 = vpop.permute.xlu1 %1035  ;;  %v1448_v58 = vpop.permute.xlu0 %1447 }
 0x1bb   : > { %v1756_v44 = vsel %vm1736_vm7, %v1723_v18, %v1448_v58  ;;  %v1643_v2 = vsel %vm1637_vm4, %v1610_v54, %v1036_v60  ;;  %v2355_v18 = vld [vmem:[%s2836_s30 + $0xc8] sm:$0xff]  ;;  %v2370_v60 = vld [vmem:[%s2836_s30 + $0x180] sm:$0xff] }
 0x1bc   : > { %1175 = vrot.lane.b32.xlu1 %v2353_v20, %s2751_s19  ;;  %1205 = vrot.lane.b32.xlu0 %v2368_v45, %s2751_s19  ;;  %v1626_v20 = vsel %vm1604_vm3, %v3610_v35, %v3912_v17 }
 0x1bd   : > { %2564 = vmatmul.mubr.msk.f32.gmra.mxu1 %vm1785_vm8, %v1756_v44 }
 0x1be   : > { %v1162_v48 = vpop.permute.xlu1 %1161  ;;  %v1068_v11 = vpop.permute.xlu0 %1067 }
 0x1bf   : > { %v1675_v43 = vsel %vm1670_vm5, %v1642_v50, %v1162_v48  ;;  %v1659_v1 = vsel %vm1637_vm4, %v1626_v20, %v1068_v11  ;;  %v2356_v20 = vld [vmem:[%s2836_s30 + $0xd8] sm:$0xff] }
 0x1c0   : > { %1301 = vrot.lane.b32.xlu1 %v2384_v24, %s2752_s5  ;;  %1207 = vrot.lane.b32.xlu0 %v2369_v40, %s2751_s19  ;;  %v2386_v24 = vld [vmem:[%s2836_s30 + $0xc1] sm:$0xff] }
 0x1c1   : > { %v2371_v40 = vld [vmem:[%s2836_s30 + $0x188] sm:$0xff] }
 0x1c2   : > { %v1164_v62 = vpop.permute.xlu1 %1163  ;;  %v1194_v25 = vpop.permute.xlu0 %1193 }
 0x1c3   : > { %v1691_v51 = vsel %vm1670_vm5, %v1658_v38, %v1194_v25  ;;  %v1676_v15 = vsel %vm1670_vm5, %v1643_v2, %v1164_v62 }
 0x1c4   : > { %953 = vrot.lane.b32.xlu1 %v2306_v8, %s2749_s7  ;;  %1333 = vrot.lane.b32.xlu0 %v2306_v8, %s2752_s5  ;;  %v2308_v8 = vld [vmem:[%s2836_s30 + $0x181] sm:$0xff] }
 0x1c6   : > { %v1290_v3 = vpop.permute.xlu1 %1289  ;;  %v1196_v34 = vpop.permute.xlu0 %1195 }
 0x1c7   : > { %v1708_v47 = vsel %vm1703_vm6, %v1675_v43, %v1290_v3  ;;  %v1692_v45 = vsel %vm1670_vm5, %v1659_v1, %v1196_v34 }
 0x1c8   : > { %1335 = vrot.lane.b32.xlu1 %v2401_v30, %s2752_s5  ;;  %1303 = vrot.lane.b32.xlu0 %v2385_v52, %s2752_s5  ;;  %v2387_v52 = vld [vmem:[%s2836_s30 + $0xc9] sm:$0xff] }
 0x1ca   : > { %v3959_v12 = vpop.permute.xlu1 %941  ;;  %v1322_v56 = vpop.permute.xlu0 %1321 }
 0x1cb   : > { %v1724_v5 = vsel %vm1703_vm6, %v1691_v51, %v1322_v56  ;;  %v1627_v50 = vsel %vm1604_vm3, %v3626_v49, %v3959_v12 }
 0x1cc   : > { %1461 = vrot.lane.b32.xlu1 %v2432_v29, %s2753_s27  ;;  %1429 = vrot.lane.b32.xlu0 %v2416_v4, %s2753_s27 }
 0x1ce   : > { %v1324_v22 = vpop.permute.xlu1 %1323  ;;  %v1292_v53 = vpop.permute.xlu0 %1291 }
 0x1cf   : > { %v1709_v59 = vsel %vm1703_vm6, %v1676_v15, %v1292_v53  ;;  %v1725_v58 = vsel %vm1703_vm6, %v1692_v45, %v1324_v22  ;;  %v2373_v45 = vld [vmem:[%s2836_s30 + $0x1a0] sm:$0xff] }
 0x1d0   : > { %1049 = vrot.lane.b32.xlu1 %v2416_v4, %s2750_s8  ;;  %955 = vrot.lane.b32.xlu0 %v2401_v30, %s2749_s7  ;;  %v2403_v30 = vld [vmem:[%s2836_s30 + $0x189] sm:$0xff] }
 0x1d1   : > { %v2418_v4 = vld [vmem:[%s2836_s30 + $0xc2] sm:$0xff] }
 0x1d2   : > { %v1450_v10 = vpop.permute.xlu1 %1449  ;;  %v1418_v7 = vpop.permute.xlu0 %1417 }
 0x1d3   : > { %v1757_v37 = vsel %vm1736_vm7, %v1724_v5, %v1450_v10  ;;  %v1741_v63 = vsel %vm1736_vm7, %v1708_v47, %v1418_v7  ;;  %v2435_v10 = vld [vmem:[%s2836_s30 + $0x18a] sm:$0xff] }
 0x1d4   : > { %1431 = vrot.lane.b32.xlu1 %v2417_v14, %s2753_s27  ;;  %1081 = vrot.lane.b32.xlu0 %v2432_v29, %s2750_s8  ;;  %v2434_v29 = vld [vmem:[%s2836_s30 + $0x182] sm:$0xff]  ;;  %v2419_v7 = vld [vmem:[%s2836_s30 + $0xca] sm:$0xff] }
 0x1d5   : > { %2542 = vmatprep.mubr.msk.f32.mxu0 %vm1785_vm8, %v1741_v63  ;;  %2566 = vmatprep.mubr.msk.f32.mxu1 %vm1785_vm8, %v1757_v37 }
 0x1d6   : > { %v1038_v57 = vpop.permute.xlu1 %1037  ;;  %v3985_v33 = vpop.permute.xlu0 %943 }
 0x1d7   : > { %v1644_v38 = vsel %vm1637_vm4, %v1611_v13, %v1038_v57 }
 0x1d8   : > { %1051 = vrot.lane.b32.xlu1 %v2417_v14, %s2750_s8  ;;  %1463 = vrot.lane.b32.xlu0 %v2433_v46, %s2753_s27 }
 0x1da   : > { %v1420_v9 = vpop.permute.xlu1 %1419  ;;  %v1070_v27 = vpop.permute.xlu0 %1069 }
 0x1db   : > { %v1742_v19 = vsel %vm1736_vm7, %v1709_v59, %v1420_v9  ;;  %v1660_v43 = vsel %vm1637_vm4, %v1627_v50, %v1070_v27  ;;  %v1628_v59 = vsel %vm1604_vm3, %v3622_v42, %v3985_v33  ;;  %v2372_v27 = vld [vmem:[%s2836_s30 + $0x198] sm:$0xff] }
 0x1dc   : > { %1177 = vrot.lane.b32.xlu1 %v2354_v31, %s2751_s19  ;;  %1083 = vrot.lane.b32.xlu0 %v2433_v46, %s2750_s8  ;;  %v1612_v46 = vsel %vm1604_vm3, %v3534_v36, %v3705_v28 }
 0x1dd   : > { %2543 = vmatmul.mubr.msk.f32.gmra.mxu0 %vm1785_vm8, %v1742_v19 }
 0x1de   : > { %v1040_v35 = vpop.permute.xlu1 %1039  ;;  %v1452_v17 = vpop.permute.xlu0 %1451 }
 0x1df   : > { %v1758_v44 = vsel %vm1736_vm7, %v1725_v58, %v1452_v17  ;;  %v1645_v57 = vsel %vm1637_vm4, %v1612_v46, %v1040_v35  ;;  %v2404_v35 = vld [vmem:[%s2836_s30 + $0x199] sm:$0xff] }
 0x1e0   : > { %1179 = vrot.lane.b32.xlu1 %v2355_v18, %s2751_s19  ;;  %1209 = vrot.lane.b32.xlu0 %v2370_v60, %s2751_s19  ;;  %v2357_v18 = vld [vmem:[%s2836_s30 + $0xe0] sm:$0xff] }
 0x1e1   : > { %2567 = vmatmul.mubr.msk.f32.gmra.mxu1 %vm1785_vm8, %v1758_v44  ;;  %v2388_v17 = vld [vmem:[%s2836_s30 + $0xd9] sm:$0xff] }
 0x1e2   : > { %v1166_v48 = vpop.permute.xlu1 %1165  ;;  %v1072_v11 = vpop.permute.xlu0 %1071 }
 0x1e3   : > { %v1677_v51 = vsel %vm1670_vm5, %v1644_v38, %v1166_v48  ;;  %v1661_v28 = vsel %vm1637_vm4, %v1628_v59, %v1072_v11  ;;  %v2389_v48 = vld [vmem:[%s2836_s30 + $0xe1] sm:$0xff] }
 0x1e4   : > { %1305 = vrot.lane.b32.xlu1 %v2386_v24, %s2752_s5  ;;  %1211 = vrot.lane.b32.xlu0 %v2371_v40, %s2751_s19  ;;  %v2405_v40 = vld [vmem:[%s2836_s30 + $0x1a1] sm:$0xff] }
 0x1e6   : > { %v1168_v62 = vpop.permute.xlu1 %1167  ;;  %v1198_v25 = vpop.permute.xlu0 %1197 }
 0x1e7   : > { %v1693_v14 = vsel %vm1670_vm5, %v1660_v43, %v1198_v25  ;;  %v1678_v54 = vsel %vm1670_vm5, %v1645_v57, %v1168_v62  ;;  %v2436_v62 = vld [vmem:[%s2836_s30 + $0x19a] sm:$0xff] }
 0x1e8   : > { %957 = vrot.lane.b32.xlu1 %v2308_v8, %s2749_s7  ;;  %1337 = vrot.lane.b32.xlu0 %v2308_v8, %s2752_s5  ;;  %v2420_v25 = vld [vmem:[%s2836_s30 + $0xda] sm:$0xff] }
 0x1ea   : > { %v1294_v3 = vpop.permute.xlu1 %1293  ;;  %v1200_v34 = vpop.permute.xlu0 %1199 }
 0x1eb   : > { %v1710_v23 = vsel %vm1703_vm6, %v1677_v51, %v1294_v3  ;;  %v1694_v9 = vsel %vm1670_vm5, %v1661_v28, %v1200_v34  ;;  %v2437_v3 = vld [vmem:[%s2836_s30 + $0x1a2] sm:$0xff] }
 0x1ec   : > { %1339 = vrot.lane.b32.xlu1 %v2403_v30, %s2752_s5  ;;  %1307 = vrot.lane.b32.xlu0 %v2387_v52, %s2752_s5  ;;  %v2421_v34 = vld [vmem:[%s2836_s30 + $0xe2] sm:$0xff]  ;;  %s175_s30 = sand.u32 1, %s2728_s13  }
 0x1ed   : > { %s4312_s15 = scalar_lea.sflag [#allocation3], %s175_s30 }
 0x1ee   : > { %v4025_v56 = vpop.permute.xlu1 %945  ;;  %v1326_v22 = vpop.permute.xlu0 %1325 }
 0x1ef   : > { %v1726_v21 = vsel %vm1703_vm6, %v1693_v14, %v1326_v22  ;;  %v1613_v22 = vsel %vm1604_vm3, %v3550_v39, %v3713_v61 }
 0x1f0   : > { %1465 = vrot.lane.b32.xlu1 %v2434_v29, %s2753_s27  ;;  %1433 = vrot.lane.b32.xlu0 %v2418_v4, %s2753_s27 }
 0x1f2   : > { %v1328_v53 = vpop.permute.xlu1 %1327  ;;  %v1296_v26 = vpop.permute.xlu0 %1295 }
 0x1f3   : > { %v1711_v2 = vsel %vm1703_vm6, %v1678_v54, %v1296_v26  ;;  %v1727_v42 = vsel %vm1703_vm6, %v1694_v9, %v1328_v53  ;;  %v1629_v53 = vsel %vm1604_vm3, %v3638_v0, %v4025_v56 }
 0x1f4   : > { %959 = vrot.lane.b32.xlu1 %v2403_v30, %s2749_s7  ;;  %927 = vrot.lane.b32.xlu0 %v2387_v52, %s2749_s7  ;;  %s2244_s7 = sshll.u32 %s175_s30, 8 }
 0x1f5   : > { %s4172_s28 = scalar_lea.vmem [#allocation2], %s2244_s7 }
 0x1f6   : > { %v1454_v47 = vpop.permute.xlu1 %1453  ;;  %v1422_v49 = vpop.permute.xlu0 %1421 }
 0x1f7   : > { %v1759_v12 = vsel %vm1736_vm7, %v1726_v21, %v1454_v47  ;;  %v1743_v5 = vsel %vm1736_vm7, %v1710_v23, %v1422_v49  ;;  %v1614_v21 = vsel %vm1604_vm3, %v3546_v41, %v3711_v55 }
 0x1f8   : > { %1085 = vrot.lane.b32.xlu1 %v2434_v29, %s2750_s8  ;;  %1053 = vrot.lane.b32.xlu0 %v2418_v4, %s2750_s8 }
 0x1f9   : > { %2545 = vmatprep.mubr.msk.f32.mxu0 %vm1785_vm8, %v1743_v5  ;;  %2569 = vmatprep.mubr.msk.f32.mxu1 %vm1785_vm8, %v1759_v12 }
 0x1fa   : > { %v1042_v37 = vpop.permute.xlu1 %1041  ;;  %v4051_v63 = vpop.permute.xlu0 %947 }
 0x1fb   : > { %v1646_v26 = vsel %vm1637_vm4, %v1613_v22, %v1042_v37 }
 0x1fc   : > { %1467 = vrot.lane.b32.xlu1 %v2435_v10, %s2753_s27  ;;  %1435 = vrot.lane.b32.xlu0 %v2419_v7, %s2753_s27 }
 0x1fe   : > { %v1424_v15 = vpop.permute.xlu1 %1423  ;;  %v1074_v31 = vpop.permute.xlu0 %1073 }
 0x1ff   : > { %v1744_v36 = vsel %vm1736_vm7, %v1711_v2, %v1424_v15  ;;  %v1662_v13 = vsel %vm1637_vm4, %v1629_v53, %v1074_v31 }
 0x200   : > { %1087 = vrot.lane.b32.xlu1 %v2435_v10, %s2750_s8  ;;  %1055 = vrot.lane.b32.xlu0 %v2419_v7, %s2750_s8  ;;  %v1630_v7 = vsel %vm1604_vm3, %v3634_v6, %v4051_v63 }
 0x201   : > { %2546 = vmatmul.mubr.msk.f32.gmra.mxu0 %vm1785_vm8, %v1744_v36 }
 0x202   : > { %v1044_v33 = vpop.permute.xlu1 %1043  ;;  %v1456_v19 = vpop.permute.xlu0 %1455 }
 0x203   : > { %v1760_v1 = vsel %vm1736_vm7, %v1727_v42, %v1456_v19  ;;  %v1647_v47 = vsel %vm1637_vm4, %v1614_v21, %v1044_v33  ;;  %v1615_v42 = vsel %vm1604_vm3, %v3562_v16, %v3721_v32  ;;  %v4501_v33 = vld [vmem:[#allocation43_spill] sm:$0xff] }
 0x204   : > { %1213 = vrot.lane.b32.xlu1 %v2372_v27, %s2751_s19  ;;  %1181 = vrot.lane.b32.xlu0 %v2356_v20, %s2751_s19 }
 0x205   : > { %2570 = vmatmul.mubr.msk.f32.gmra.mxu1 %vm1785_vm8, %v1760_v1 }
 0x206   : > { %v1170_v60 = vpop.permute.xlu1 %1169  ;;  %v1076_v58 = vpop.permute.xlu0 %1075 }
 0x207   : > { %v1679_v50 = vsel %vm1670_vm5, %v1646_v26, %v1170_v60  ;;  %v1663_v46 = vsel %vm1637_vm4, %v1630_v7, %v1076_v58 }
 0x208   : > { %1215 = vrot.lane.b32.xlu1 %v2373_v45, %s2751_s19  ;;  %1183 = vrot.lane.b32.xlu0 %v2357_v18, %s2751_s19 }
 0x20a   : > { %v1172_v44 = vpop.permute.xlu1 %1171  ;;  %v1202_v24 = vpop.permute.xlu0 %1201 }
 0x20b   : > { %v1695_v38 = vsel %vm1670_vm5, %v1662_v13, %v1202_v24  ;;  %v1680_v49 = vsel %vm1670_vm5, %v1647_v47, %v1172_v44 }
 0x20c   : > { %1341 = vrot.lane.b32.xlu1 %v2404_v35, %s2752_s5  ;;  %1309 = vrot.lane.b32.xlu0 %v2388_v17, %s2752_s5 }
 0x20e   : > { %v1298_v11 = vpop.permute.xlu1 %1297  ;;  %v1204_v8 = vpop.permute.xlu0 %1203 }
 0x20f   : > { %v1712_v43 = vsel %vm1703_vm6, %v1679_v50, %v1298_v11  ;;  %v1696_v41 = vsel %vm1670_vm5, %v1663_v46, %v1204_v8  ;;  %v4503_v11 = vld [vmem:[#allocation34_spill] sm:$0xff] }
 0x210   : > { %1343 = vrot.lane.b32.xlu1 %v2405_v40, %s2752_s5  ;;  %1311 = vrot.lane.b32.xlu0 %v2389_v48, %s2752_s5  ;;  %v4502_v48 = vld [vmem:[#allocation16_spill] sm:$0xff]  ;;  %s2156_s5 = sshll.u32 %s4172_s28, 4  ;;  %s4306_s5 = int_to_ptr.vmem [resolvable:$true] %s2156_s5 }
 0x211   : > { %v1616_v8 = vsel %vm1604_vm3, %v4503_v11, %v4502_v48  ;;  %s2668_s11 = scalar_lea.vmem %s4306_s5, 4096  ;;  %p2675_p1 = scmp.lt.s32.totalorder %s4306_s5, %s2673_s21 }
 0x212   : > { %v950_v30 = vpop.permute.xlu1 %949  ;;  %v1330_v52 = vpop.permute.xlu0 %1329  ;;  %p2669_p12 = scmp.ne.s32.totalorder %s4306_s5, %s2668_s11  ;;  %p2676_p2 = scmp.lt.s32.totalorder %s2674_s23, %s2668_s11 }
 0x213   : > { %v1728_v39 = vsel %vm1703_vm6, %v1695_v38, %v1330_v52  ;;  %v1631_v19 = vsel %vm1604_vm3, %v4501_v33, %v950_v30 }
 0x214   : > { %1469 = vrot.lane.b32.xlu1 %v2436_v62, %s2753_s27  ;;  %1437 = vrot.lane.b32.xlu0 %v2420_v25, %s2753_s27  ;;  %p2670_p13 = pnand %p2669_p12, %p2816_p4  ;;  %p2677_p3 = por %p2676_p2, %p2675_p1 }
 0x216   : > { %v1332_v29 = vpop.permute.xlu1 %1331  ;;  %v1300_v4 = vpop.permute.xlu0 %1299  ;;  %p2671_p0 = pneg %p2670_p13 }
 0x217   : > { %v1713_v12 = vsel %vm1703_vm6, %v1680_v49, %v1300_v4  ;;  %v1729_v55 = vsel %vm1703_vm6, %v1696_v41, %v1332_v29 }
 0x218   : > { %1471 = vrot.lane.b32.xlu1 %v2437_v3, %s2753_s27  ;;  %1439 = vrot.lane.b32.xlu0 %v2421_v34, %s2753_s27  ;;  %v4504_v34 = vld [vmem:[#allocation37_spill] sm:$0xff]  ;;  %p2678_p5 = pnand %p2677_p3, %p2671_p0 }
 0x21a   : > { %v1458_v61 = vpop.permute.xlu1 %1457  ;;  %v1426_v51 = vpop.permute.xlu0 %1425 }
 0x21b   : > { %v1761_v0 = vsel %vm1736_vm7, %v1728_v39, %v1458_v61  ;;  %v1745_v56 = vsel %vm1736_vm7, %v1712_v43, %v1426_v51 }
 0x21c   : > { %2548 = vmatprep.mubr.msk.f32.mxu0 %vm1785_vm8, %v1745_v56  ;;  %2572 = vmatprep.mubr.msk.f32.mxu1 %vm1785_vm8, %v1761_v0  ;;  %v4169_v0 = vld [vmem:[%s4360_s2] ss:$0 sm:$0xff] }
 0x21e   : > { %v1046_v14 = vpop.permute.xlu1 %1045  ;;  %v952_v23 = vpop.permute.xlu0 %951 }
 0x21f   : > { %v1648_v1 = vsel %vm1637_vm4, %v1615_v42, %v1046_v14  ;;  %v1632_v29 = vsel %vm1604_vm3, %v4504_v34, %v952_v23 }
 0x222   : > { %v1428_v5 = vpop.permute.xlu1 %1427  ;;  %v1078_v10 = vpop.permute.xlu0 %1077 }
 0x223   : > { %v1746_v37 = vsel %vm1736_vm7, %v1713_v12, %v1428_v5  ;;  %v1664_v45 = vsel %vm1637_vm4, %v1631_v19, %v1078_v10 }
 0x224   : > { %2549 = vmatmul.mubr.msk.f32.gmra.mxu0 %vm1785_vm8, %v1746_v37 }
 0x226   : > { %v1048_v57 = vpop.permute.xlu1 %1047  ;;  %v1460_v54 = vpop.permute.xlu0 %1459 }
 0x227   : > { %v1762_v2 = vsel %vm1736_vm7, %v1729_v55, %v1460_v54  ;;  %v1649_v62 = vsel %vm1637_vm4, %v1616_v8, %v1048_v57  ;;  %v4505_v57 = vld [vmem:[#allocation9_spill] sm:$0xff]  ;;  %v4506_v54 = vld [vmem:[#allocation14_spill] sm:$0xff] }
 0x228   : > { %2573 = vmatmul.mubr.msk.f32.gmra.mxu1 %vm1785_vm8, %v1762_v2  ;;  %v1617_v2 = vsel %vm1604_vm3, %v4506_v54, %v4505_v57 }
 0x22a   : > { %v1174_v15 = vpop.permute.xlu1 %1173  ;;  %v1080_v31 = vpop.permute.xlu0 %1079 }
 0x22b   : > { %v1681_v18 = vsel %vm1670_vm5, %v1648_v1, %v1174_v15  ;;  %v1665_v22 = vsel %vm1637_vm4, %v1632_v29, %v1080_v31  ;;  %v4507_v15 = vld [vmem:[#allocation39_spill] sm:$0xff] }
 0x22e   : > { %v1176_v59 = vpop.permute.xlu1 %1175  ;;  %v1206_v6 = vpop.permute.xlu0 %1205 }
 0x22f   : > { %v1697_v60 = vsel %vm1670_vm5, %v1664_v45, %v1206_v6  ;;  %v1682_v25 = vsel %vm1670_vm5, %v1649_v62, %v1176_v59 }
 0x232   : > { %v1302_v63 = vpop.permute.xlu1 %1301  ;;  %v1208_v36 = vpop.permute.xlu0 %1207 }
 0x233   : > { %v1714_v58 = vsel %vm1703_vm6, %v1681_v18, %v1302_v63  ;;  %v1698_v53 = vsel %vm1670_vm5, %v1665_v22, %v1208_v36 }
 0x236   : > { %v4129_v28 = vpop.permute.xlu1 %953  ;;  %v1334_v9 = vpop.permute.xlu0 %1333 }
 0x237   : > { %v1730_v35 = vsel %vm1703_vm6, %v1697_v60, %v1334_v9  ;;  %v1633_v31 = vsel %vm1604_vm3, %v4507_v15, %v4129_v28  ;;  %v4508_v60 = vld [vmem:[#allocation10_spill] sm:$0xff] }
 0x238   : > { %v4514_v15 = vld [vmem:[#allocation6_spill] sm:$0xff] }
 0x23a   : > { %v1336_v27 = vpop.permute.xlu1 %1335  ;;  %v1304_v20 = vpop.permute.xlu0 %1303 }
 0x23b   : > { %v1715_v30 = vsel %vm1703_vm6, %v1682_v25, %v1304_v20  ;;  %v1731_v26 = vsel %vm1703_vm6, %v1698_v53, %v1336_v27 }
 0x23e   : > { %v1462_v17 = vpop.permute.xlu1 %1461  ;;  %v1430_v44 = vpop.permute.xlu0 %1429 }
 0x23f   : > { %v1763_v24 = vsel %vm1736_vm7, %v1730_v35, %v1462_v17  ;;  %v1747_v16 = vsel %vm1736_vm7, %v1714_v58, %v1430_v44  ;;  %v4509_v58 = vld [vmem:[#allocation35_spill] sm:$0xff]  ;;  %v4510_v17 = vld [vmem:[#allocation38_spill] sm:$0xff] }
 0x240   : > { %2551 = vmatprep.mubr.msk.f32.mxu0 %vm1785_vm8, %v1747_v16  ;;  %2575 = vmatprep.mubr.msk.f32.mxu1 %vm1785_vm8, %v1763_v24  ;;  %v1618_v35 = vsel %vm1604_vm3, %v4509_v58, %v4508_v60 }
 0x242   : > { %v1050_v32 = vpop.permute.xlu1 %1049  ;;  %v4146_v40 = vpop.permute.xlu0 %955 }
 0x243   : > { %v1650_v59 = vsel %vm1637_vm4, %v1617_v2, %v1050_v32  ;;  %v1634_v44 = vsel %vm1604_vm3, %v4510_v17, %v4146_v40 }
 0x246   : > { %v1432_v52 = vpop.permute.xlu1 %1431  ;;  %v1082_v3 = vpop.permute.xlu0 %1081 }
 0x247   : > { %v1748_v4 = vsel %vm1736_vm7, %v1715_v30, %v1432_v52  ;;  %v1666_v6 = vsel %vm1637_vm4, %v1633_v31, %v1082_v3 }
 0x248   : > { %2552 = vmatmul.mubr.msk.f32.gmra.mxu0 %vm1785_vm8, %v1748_v4 }
 0x24a   : > { %v1052_v13 = vpop.permute.xlu1 %1051  ;;  %v1464_v50 = vpop.permute.xlu0 %1463 }
 0x24b   : > { %v1764_v38 = vsel %vm1736_vm7, %v1731_v26, %v1464_v50  ;;  %v1651_v24 = vsel %vm1637_vm4, %v1618_v35, %v1052_v13 }
 0x24c   : > { %2576 = vmatmul.mubr.msk.f32.gmra.mxu1 %vm1785_vm8, %v1764_v38 }
 0x24e   : > { %v1178_v43 = vpop.permute.xlu1 %1177  ;;  %v1084_v39 = vpop.permute.xlu0 %1083 }
 0x24f   : > { %v1683_v63 = vsel %vm1670_vm5, %v1650_v59, %v1178_v43  ;;  %v1667_v16 = vsel %vm1637_vm4, %v1634_v44, %v1084_v39  ;;  %v4515_v59 = vld [vmem:[#allocation36_spill] sm:$0xff] }
 0x252   : > { %v1180_v61 = vpop.permute.xlu1 %1179  ;;  %v1210_v51 = vpop.permute.xlu0 %1209 }
 0x253   : > { %v1699_v36 = vsel %vm1670_vm5, %v1666_v6, %v1210_v51  ;;  %v1684_v32 = vsel %vm1670_vm5, %v1651_v24, %v1180_v61 }
 0x255   : > { %v2538_v56 = vpop.f32.mrf.mxu0 }
 0x256   : > { %v1954_v14 = vadd.f32 %v2538_v56, %v4169_v0  ;;  %v1306_v23 = vpop.permute.xlu1 %1305  ;;  %v1212_v21 = vpop.permute.xlu0 %1211 }
 0x257   : > { %v1948_v47 = vpop.f32.mrf.mxu0  ;;  %v1716_v9 = vsel %vm1703_vm6, %v1683_v63, %v1306_v23  ;;  %v1700_v48 = vsel %vm1670_vm5, %v1667_v16, %v1212_v21  ;;  %v4511_v21 = vld [vmem:[#allocation15_spill] sm:$0xff] }
 0x258   : > { %2108 = vst [vmem:[%s4172_s28 + $0x8] sm:$0xff] %v1954_v14  ;;  %v1949_v49 = vadd.f32 %v4169_v0, %v1948_v47  ;;  %v4512_v47 = vld [vmem:[#allocation42_spill] sm:$0xff] }
 0x259   : > { %v2562_v12 = vpop.f32.mrf.mxu1 }
 0x25a   : > { %2107 = vst [vmem:[%s4172_s28] sm:$0xff] %v1949_v49  ;;  %v2034_v5 = vadd.f32 %v2562_v12, %v4169_v0  ;;  %v4178_v10 = vpop.permute.xlu1 %957  ;;  %v1338_v7 = vpop.permute.xlu0 %1337  ;;  %v1619_v49 = vsel %vm1604_vm3, %v4512_v47, %v4511_v21  ;;  %v4513_v12 = vld [vmem:[#allocation5_spill] sm:$0xff] }
 0x25b   : > { %v2028_v37 = vpop.f32.mrf.mxu1  ;;  %v1732_v27 = vsel %vm1703_vm6, %v1699_v36, %v1338_v7 }
 0x25c   : > { %2124 = vst [vmem:[%s4172_s28 + $0x88] sm:$0xff] %v2034_v5  ;;  %v2029_v46 = vadd.f32 %v4169_v0, %v2028_v37  ;;  %v1635_v5 = vsel %vm1604_vm3, %v4513_v12, %v4178_v10 }
 0x25e   : > { %2123 = vst [vmem:[%s4172_s28 + $0x80] sm:$0xff] %v2029_v46  ;;  %v1340_v41 = vpop.permute.xlu1 %1339  ;;  %v1308_v55 = vpop.permute.xlu0 %1307 }
 0x25f   : > { %v1733_v11 = vsel %vm1703_vm6, %v1700_v48, %v1340_v41  ;;  %v1717_v8 = vsel %vm1703_vm6, %v1684_v32, %v1308_v55 }
 0x262   : > { %v1466_v20 = vpop.permute.xlu1 %1465  ;;  %v1434_v42 = vpop.permute.xlu0 %1433 }
 0x263   : > { %v1765_v33 = vsel %vm1736_vm7, %v1732_v27, %v1466_v20  ;;  %v1749_v19 = vsel %vm1736_vm7, %v1716_v9, %v1434_v42 }
 0x264   : > { %2554 = vmatprep.mubr.msk.f32.mxu0 %vm1785_vm8, %v1749_v19  ;;  %2578 = vmatprep.mubr.msk.f32.mxu1 %vm1785_vm8, %v1765_v33 }
 0x266   : > { %v960_v28 = vpop.permute.xlu1 %959  ;;  %v928_v1 = vpop.permute.xlu0 %927 }
 0x267   : > { %v1636_v31 = vsel %vm1604_vm3, %v4514_v15, %v960_v28  ;;  %v1620_v10 = vsel %vm1604_vm3, %v4515_v59, %v928_v1 }
 0x26a   : > { %v1086_v45 = vpop.permute.xlu1 %1085  ;;  %v1054_v18 = vpop.permute.xlu0 %1053 }
 0x26b   : > { %v1668_v7 = vsel %vm1637_vm4, %v1635_v5, %v1086_v45  ;;  %v1652_v37 = vsel %vm1637_vm4, %v1619_v49, %v1054_v18 }
 0x26e   : > { %v1468_v62 = vpop.permute.xlu1 %1467  ;;  %v1436_v25 = vpop.permute.xlu0 %1435 }
 0x26f   : > { %v1766_v30 = vsel %vm1736_vm7, %v1733_v11, %v1468_v62  ;;  %v1750_v40 = vsel %vm1736_vm7, %v1717_v8, %v1436_v25 }
 0x270   : > { %2555 = vmatmul.mubr.msk.f32.gmra.mxu0 %vm1785_vm8, %v1750_v40  ;;  %2579 = vmatmul.mubr.msk.f32.gmra.mxu1 %vm1785_vm8, %v1766_v30 }
 0x272   : > { %v1088_v52 = vpop.permute.xlu1 %1087  ;;  %v1056_v3 = vpop.permute.xlu0 %1055 }
 0x273   : > { %v1669_v36 = vsel %vm1637_vm4, %v1636_v31, %v1088_v52  ;;  %v1653_v9 = vsel %vm1637_vm4, %v1620_v10, %v1056_v3 }
 0x276   : > { %v1214_v34 = vpop.permute.xlu1 %1213  ;;  %v1182_v29 = vpop.permute.xlu0 %1181 }
 0x277   : > { %v1701_v46 = vsel %vm1670_vm5, %v1668_v7, %v1214_v34  ;;  %v1685_v41 = vsel %vm1670_vm5, %v1652_v37, %v1182_v29 }
 0x279   : > { %v2541_v4 = vpop.f32.mrf.mxu0 }
 0x27a   : > { %v1964_v22 = vadd.f32 %v2541_v4, %v4169_v0  ;;  %v1216_v53 = vpop.permute.xlu1 %1215  ;;  %v1184_v26 = vpop.permute.xlu0 %1183 }
 0x27b   : > { %v1958_v13 = vpop.f32.mrf.mxu0  ;;  %v1702_v27 = vsel %vm1670_vm5, %v1669_v36, %v1216_v53  ;;  %v1686_v20 = vsel %vm1670_vm5, %v1653_v9, %v1184_v26 }
 0x27c   : > { %2110 = vst [vmem:[%s4172_s28 + $0x18] sm:$0xff] %v1964_v22  ;;  %v1959_v50 = vadd.f32 %v4169_v0, %v1958_v13 }
 0x27d   : > { %v2565_v38 = vpop.f32.mrf.mxu1 }
 0x27e   : > { %2109 = vst [vmem:[%s4172_s28 + $0x10] sm:$0xff] %v1959_v50  ;;  %v2044_v43 = vadd.f32 %v2565_v38, %v4169_v0  ;;  %v1342_v39 = vpop.permute.xlu1 %1341  ;;  %v1310_v61 = vpop.permute.xlu0 %1309 }
 0x27f   : > { %v2038_v51 = vpop.f32.mrf.mxu1  ;;  %v1734_v55 = vsel %vm1703_vm6, %v1701_v46, %v1342_v39  ;;  %v1718_v57 = vsel %vm1703_vm6, %v1685_v41, %v1310_v61 }
 0x280   : > { %2126 = vst [vmem:[%s4172_s28 + $0x98] sm:$0xff] %v2044_v43  ;;  %v2039_v56 = vadd.f32 %v4169_v0, %v2038_v51 }
 0x282   : > { %2125 = vst [vmem:[%s4172_s28 + $0x90] sm:$0xff] %v2039_v56  ;;  %v1344_v14 = vpop.permute.xlu1 %1343  ;;  %v1312_v23 = vpop.permute.xlu0 %1311 }
 0x283   : > { %v1735_v42 = vsel %vm1703_vm6, %v1702_v27, %v1344_v14  ;;  %v1719_v33 = vsel %vm1703_vm6, %v1686_v20, %v1312_v23 }
 0x286   : > { %v1470_v54 = vpop.permute.xlu1 %1469  ;;  %v1438_v2 = vpop.permute.xlu0 %1437 }
 0x287   : > { %v1767_v6 = vsel %vm1736_vm7, %v1734_v55, %v1470_v54  ;;  %v1751_v63 = vsel %vm1736_vm7, %v1718_v57, %v1438_v2 }
 0x288   : > { %2557 = vmatprep.mubr.msk.f32.mxu0 %vm1785_vm8, %v1751_v63  ;;  %2581 = vmatprep.mubr.msk.f32.mxu1 %vm1785_vm8, %v1767_v6 }
 0x28a   : > { %v1472_v19 = vpop.permute.xlu1 %1471  ;;  %v1440_v28 = vpop.permute.xlu0 %1439 }
 0x28b   : > { %v1768_v1 = vsel %vm1736_vm7, %v1735_v42, %v1472_v19  ;;  %v1752_v45 = vsel %vm1736_vm7, %v1719_v33, %v1440_v28 }
 0x28c   : > { %2558 = vmatmul.mubr.msk.f32.gmra.mxu0 %vm1785_vm8, %v1752_v45  ;;  %2582 = vmatmul.mubr.msk.f32.gmra.mxu1 %vm1785_vm8, %v1768_v1 }
 0x29d   : > { %v2544_v18 = vpop.f32.mrf.mxu0 }
 0x29e   : > { %v1974_v60 = vadd.f32 %v2544_v18, %v4169_v0 }
 0x29f   : > { %v1968_v58 = vpop.f32.mrf.mxu0 }
 0x2a0   : > { %2112 = vst [vmem:[%s4172_s28 + $0x28] sm:$0xff] %v1974_v60  ;;  %v1969_v35 = vadd.f32 %v4169_v0, %v1968_v58 }
 0x2a1   : > { %v2568_v17 = vpop.f32.mrf.mxu1 }
 0x2a2   : > { %2111 = vst [vmem:[%s4172_s28 + $0x20] sm:$0xff] %v1969_v35  ;;  %v2054_v44 = vadd.f32 %v2568_v17, %v4169_v0 }
 0x2a3   : > { %v2048_v24 = vpop.f32.mrf.mxu1 }
 0x2a4   : > { %2128 = vst [vmem:[%s4172_s28 + $0xa8] sm:$0xff] %v2054_v44  ;;  %v2049_v16 = vadd.f32 %v4169_v0, %v2048_v24 }
 0x2a6   : > { %2127 = vst [vmem:[%s4172_s28 + $0xa0] sm:$0xff] %v2049_v16 }
 0x2c1   : > { %v2547_v32 = vpop.f32.mrf.mxu0 }
 0x2c2   : > { %v1984_v48 = vadd.f32 %v2547_v32, %v4169_v0 }
 0x2c3   : > { %v1978_v11 = vpop.f32.mrf.mxu0 }
 0x2c4   : > { %2114 = vst [vmem:[%s4172_s28 + $0x38] sm:$0xff] %v1984_v48  ;;  %v1979_v8 = vadd.f32 %v4169_v0, %v1978_v11 }
 0x2c5   : > { %v2571_v62 = vpop.f32.mrf.mxu1 }
 0x2c6   : > { %2113 = vst [vmem:[%s4172_s28 + $0x30] sm:$0xff] %v1979_v8  ;;  %v2064_v25 = vadd.f32 %v2571_v62, %v4169_v0 }
 0x2c7   : > { %v2058_v30 = vpop.f32.mrf.mxu1 }
 0x2c8   : > { %2130 = vst [vmem:[%s4172_s28 + $0xb8] sm:$0xff] %v2064_v25  ;;  %v2059_v40 = vadd.f32 %v4169_v0, %v2058_v30 }
 0x2ca   : > { %2129 = vst [vmem:[%s4172_s28 + $0xb0] sm:$0xff] %v2059_v40 }
 0x2e4   : > { %v2550_v52 = vpop.f32.mrf.mxu0 }
 0x2e5   : > { %v1994_v3 = vadd.f32 %v2550_v52, %v4169_v0 }
 0x2e6   : > { %v1988_v34 = vpop.f32.mrf.mxu0 }
 0x2e7   : > { %2116 = vst [vmem:[%s4172_s28 + $0x48] sm:$0xff] %v1994_v3  ;;  %v1989_v29 = vadd.f32 %v4169_v0, %v1988_v34 }
 0x2e8   : > { %v2574_v4 = vpop.f32.mrf.mxu1 }
 0x2e9   : > { %2115 = vst [vmem:[%s4172_s28 + $0x40] sm:$0xff] %v1989_v29  ;;  %v2074_v22 = vadd.f32 %v2574_v4, %v4169_v0 }
 0x2ea   : > { %v2068_v53 = vpop.f32.mrf.mxu1 }
 0x2eb   : > { %2132 = vst [vmem:[%s4172_s28 + $0xc8] sm:$0xff] %v2074_v22  ;;  %v2069_v26 = vadd.f32 %v4169_v0, %v2068_v53 }
 0x2ed   : > { %2131 = vst [vmem:[%s4172_s28 + $0xc0] sm:$0xff] %v2069_v26 }
 0x308   : > { %v2553_v13 = vpop.f32.mrf.mxu0 }
 0x309   : > { %v2004_v50 = vadd.f32 %v2553_v13, %v4169_v0 }
 0x30a   : > { %v1998_v38 = vpop.f32.mrf.mxu0 }
 0x30b   : > { %2118 = vst [vmem:[%s4172_s28 + $0x58] sm:$0xff] %v2004_v50  ;;  %v1999_v43 = vadd.f32 %v4169_v0, %v1998_v38 }
 0x30c   : > { %v2577_v39 = vpop.f32.mrf.mxu1 }
 0x30d   : > { %2117 = vst [vmem:[%s4172_s28 + $0x50] sm:$0xff] %v1999_v43  ;;  %v2084_v61 = vadd.f32 %v2577_v39, %v4169_v0 }
 0x30e   : > { %v2078_v51 = vpop.f32.mrf.mxu1 }
 0x30f   : > { %2134 = vst [vmem:[%s4172_s28 + $0xd8] sm:$0xff] %v2084_v61  ;;  %v2079_v56 = vadd.f32 %v4169_v0, %v2078_v51 }
 0x311   : > { %2133 = vst [vmem:[%s4172_s28 + $0xd0] sm:$0xff] %v2079_v56 }
 0x330   : > { %v2556_v14 = vpop.f32.mrf.mxu0  ;;  %v2580_v23 = vpop.f32.mrf.mxu1 }
 0x331   : > { %v2014_v21 = vadd.f32 %v2556_v14, %v4169_v0  ;;  %v2094_v47 = vadd.f32 %v2580_v23, %v4169_v0 }
 0x332   : > { %v2008_v49 = vpop.f32.mrf.mxu0  ;;  %v2088_v12 = vpop.f32.mrf.mxu1 }
 0x333   : > { %2120 = vst [vmem:[%s4172_s28 + $0x68] sm:$0xff] %v2014_v21  ;;  %2136 = vst [vmem:[%s4172_s28 + $0xe8] sm:$0xff] %v2094_v47  ;;  %v2009_v5 = vadd.f32 %v4169_v0, %v2008_v49  ;;  %v2089_v7 = vadd.f32 %v4169_v0, %v2088_v12 }
 0x335   : > { %2119 = vst [vmem:[%s4172_s28 + $0x60] sm:$0xff] %v2009_v5  ;;  %2135 = vst [vmem:[%s4172_s28 + $0xe0] sm:$0xff] %v2089_v7 }
 0x34c   : > { %v2559_v37 = vpop.f32.mrf.mxu0  ;;  %v2583_v46 = vpop.f32.mrf.mxu1 }
 0x34d   : > { %v2024_v41 = vadd.f32 %v2559_v37, %v4169_v0  ;;  %v2104_v55 = vadd.f32 %v2583_v46, %v4169_v0 }
 0x34e   : > { %v2018_v57 = vpop.f32.mrf.mxu0  ;;  %v2098_v54 = vpop.f32.mrf.mxu1 }
 0x34f   : > { %2122 = vst [vmem:[%s4172_s28 + $0x78] sm:$0xff] %v2024_v41  ;;  %2138 = vst [vmem:[%s4172_s28 + $0xf8] sm:$0xff] %v2104_v55  ;;  %v2019_v2 = vadd.f32 %v4169_v0, %v2018_v57  ;;  %v2099_v15 = vadd.f32 %v4169_v0, %v2098_v54 }
 0x351   : > { %2121 = vst [vmem:[%s4172_s28 + $0x70] sm:$0xff] %v2019_v2  ;;  %2137 = vst [vmem:[%s4172_s28 + $0xf0] sm:$0xff] %v2099_v15 }
 0x352   : > { %2681 = shalt.err (!%p2678_p5)
}
 0x353   : > { %s2682_s26 = scalar_lea.hbm %s4300_s10, 4096  ;;  %s2686_s7 = scalar_lea.hbm %s4361_s3, 8192 }
 0x354   : > { %p2683_p6 = scmp.ne.s32.totalorder %s4300_s10, %s2682_s26  ;;  %p2687_p10 = scmp.lt.s32.totalorder %s4300_s10, %s4361_s3 }
 0x355   : > { %p2688_p11 = scmp.lt.s32.totalorder %s2686_s7, %s2682_s26 }
 0x356   : > { %p2684_p7 = pnand %p2683_p6, %p2816_p4 }
 0x357   : > { %p2689_p12 = por %p2688_p11, %p2687_p10 }
 0x358   : > { %p2685_p9 = pneg %p2684_p7 }
 0x35a   : > { %p2690_p13 = pnand %p2689_p12, %p2685_p9 }
 0x35c   : > { %2693 = shalt.err (!%p2690_p13)
}
 0x35d   : > { %s2755_s28 = smov 128  }
 0x35e   : > { %2603 = dma.vmem_to_hbm [thread:$0]  (%p2816_p4), %s4306_s5, 4096, %s4300_s10, %s4312_s15, %s2755_s28, %s2755_s28, %s2746_s4  }
 0x35f PF: > { %p2609_p0 = scmp.ge.s32.totalorder %s2744_s17, 2  ;;  %s2171_s29 = sand.u32 1, %s2724_s12  }
 0x360   : > { %s2172_s6 = scalar_lea.sflag [#allocation3], %s2171_s29 }
 0x361   : > { %p2606_p1 = pnand %p2609_p0, %p2823_p8 }
 0x363   : > { %p2607_p2 = pneg %p2606_p1 }
 0x365   : > { %2719 = dma.done.wait (%p2607_p2), %s2172_s6, 4096  }
 0x366   : > { %2721 = vsyncadd (%p2607_p2), %s2172_s6, 4294963200  ;;  %s16_s17 = sadd.s32 1, %s2744_s17   ;;  %s4516_s12 = smov %s2728_s13 }
 0x367   : > { %p13_p3 = scmp.ge.s32.totalorder %s16_s17, 4   ;;  %s4517_s13 = smov %s2732_s14 }
 0x368   : > { %s4518_s14 = smov %s2829_s25  ;;  %s4519_s15 = smov %s2740_s16 }
 0x369   : > { %s4520_s16 = smov %s4522_s20  ;;  %15 = sbr.rel (!%p13_p3) target bundleno = 4 (0x4), region = 70 }
 0x36e   :  { %2177 = vsyncpa [#allocation3], 1 }
 0x36f   :  { %2179 = vsyncpa [#allocation3 + $0x1], 1 }

</bundles_post_ra>
